<compile_context>
chip_gen: v6e
topology: v6e:2x2x1
jax: 0.10.0
libtpu: 0.0.40
codegen_flags: <defaults>
</compile_context>

<pallas_src>
import functools

import jax
import jax.numpy as jnp
from jax.experimental import pallas as pl
from jax.experimental.pallas import tpu as pltpu

# ----------------------------- config (small, synthetic) --------------------
NUM_EDGES = 512      # E  (rows of x / rbf)
NUM_NODES = 64       # N  (dim_size of scatter)
NUM_RADIAL = 6       # R
HIDDEN = 32          # hidden_channels
OUT_CHANNELS = 16    # out_channels
NUM_LAYERS = 2       # num_layers

EDGE_TILE = 512      # edge rows per grid step (raise to 1-2K at production)
SUBLANE = 8


def _round_up(v, m):
    return (v + m - 1) // m * m


def _silu(x):
    # DimeNet uses swish/SiLU as `act`.
    return x * jax.nn.sigmoid(x)


# ----------------------------- Pallas kernel --------------------------------
def output_block_kernel(x_ref, rbf_ref, idx_ref, w_rbf_ref, w_lins_ref,
                        b_lins_ref, w_out_ref, out_ref, acc_ref,
                        *, num_layers, num_edges):
    # 1-D grid over edge tiles (reduction axis); full node accumulator in VMEM.
    e = pl.program_id(0)
    tE = x_ref.shape[0]
    n_acc = acc_ref.shape[0]

    @pl.when(e == 0)
    def _init():
        acc_ref[...] = jnp.zeros_like(acc_ref)

    # Edge-validity masks for the (possibly) ragged last tile — replaces any
    # wrapper-side padding of x / rbf / idx.
    base = e * tE
    valid_sub = (base + jax.lax.broadcasted_iota(jnp.int32, (tE, 1), 0)
                 ) < num_edges                                   # [tE, 1]
    valid_lane = (base + jax.lax.broadcasted_iota(jnp.int32, (1, tE), 1)
                  ) < num_edges                                  # [1, tE]

    # g = lin_rbf(rbf) * x at native H lanes (x never padded in HBM).
    g = jnp.dot(rbf_ref[...], w_rbf_ref[...],
                preferred_element_type=jnp.float32) * x_ref[...]
    g = jnp.where(valid_sub, g, 0.0)                             # [tE, H]

    # scatter(x, i, reduce='sum') expressed as an on-chip one-hot
    # [Nacc, tE] @ [tE, H] MXU matmul (contraction dim tE >= 256).
    idx = idx_ref[...]                                           # [1, tE] int32
    node_ids = jax.lax.broadcasted_iota(jnp.int32, (n_acc, tE), 0)
    onehot = jnp.logical_and(node_ids == idx, valid_lane).astype(jnp.float32)
    acc_ref[...] += jnp.dot(onehot, g, preferred_element_type=jnp.float32)

    # MLP + final projection once, on the last edge (reduction) step.
    @pl.when(e == pl.num_programs(0) - 1)
    def _finalize():
        h = acc_ref[...]                                         # [Nacc, H]
        for layer in range(num_layers):     # static unroll; weights resident
            h = _silu(jnp.dot(h, w_lins_ref[layer],
                              preferred_element_type=jnp.float32)
                      + b_lins_ref[layer])
        out_ref[...] = jnp.dot(h, w_out_ref[...],
                               preferred_element_type=jnp.float32)


# ----------------------------- wrapper ---------------------------------------
def output_block_forward(x, rbf, i, params, *, num_nodes, num_layers,
                         edge_tile=EDGE_TILE):
    """x: [E, H] f32, rbf: [E, R] f32, i: [E] int32 edge->node index."""
    E, H = x.shape
    R = rbf.shape[1]
    O = params["w_out"].shape[1]
    N = num_nodes
    L = num_layers

    # Edge tile: multiple of 128 lanes (for the [1, tE] idx block), capped
    # near E so toy shapes collapse to a single grid step.
    tE = max(128, min(edge_tile, _round_up(E, 128)))
    n_edge_tiles = pl.cdiv(E, tE)
    Nacc = _round_up(N, SUBLANE)         # sublane-aligned node accumulator

    idx2d = i.astype(jnp.int32).reshape(1, E)   # cheap reshape, no padding copy

    kernel = functools.partial(output_block_kernel,
                               num_layers=L, num_edges=E)

    out = pl.pallas_call(
        kernel,
        out_shape=jax.ShapeDtypeStruct((Nacc, O), jnp.float32),
        grid_spec=pltpu.PrefetchScalarGridSpec(
            num_scalar_prefetch=0,
            grid=(n_edge_tiles,),
            in_specs=[
                pl.BlockSpec((tE, H), lambda e: (e, 0)),        # x (native H)
                pl.BlockSpec((tE, R), lambda e: (e, 0)),        # rbf (native R)
                pl.BlockSpec((1, tE), lambda e: (0, e)),        # edge->node idx
                pl.BlockSpec((R, H), lambda e: (0, 0)),         # w_rbf
                pl.BlockSpec((L, H, H), lambda e: (0, 0, 0)),   # w_lins
                pl.BlockSpec((L, 1, H), lambda e: (0, 0, 0)),   # b_lins
                pl.BlockSpec((H, O), lambda e: (0, 0)),         # w_out
            ],
            out_specs=pl.BlockSpec((Nacc, O), lambda e: (0, 0)),
            scratch_shapes=[pltpu.VMEM((Nacc, H), jnp.float32)],
        ),
        compiler_params=pltpu.CompilerParams(
            dimension_semantics=("arbitrary",)),
    )(x, rbf, idx2d, params["w_rbf"], params["w_lins"], params["b_lins"],
      params["w_out"])

    return out[:N]


# ----------------------------- parameter init -------------------------------
def init_params(key):
    # TODO(synk): glorot_orthogonal is approximated by scaled normal init
    # (deterministic); module's default output_initializer='zeros' would give
    # an all-zero output, so we use the 'glorot_orthogonal' branch here.
    k1, k2, k3, _ = jax.random.split(key, 4)
    scale_rbf = (2.0 / (NUM_RADIAL + HIDDEN)) ** 0.5
    scale_hid = (2.0 / (HIDDEN + HIDDEN)) ** 0.5
    scale_out = (2.0 / (HIDDEN + OUT_CHANNELS)) ** 0.5
    params = {
        # stored as [in, out] so kernel does x @ W (== PyTorch x @ W.T)
        "w_rbf": scale_rbf * jax.random.normal(
            k1, (NUM_RADIAL, HIDDEN), jnp.float32),
        "w_lins": scale_hid * jax.random.normal(
            k2, (NUM_LAYERS, HIDDEN, HIDDEN), jnp.float32),
        # biases reset to zero in reset_parameters(); keep [L, 1, H]
        "b_lins": jnp.zeros((NUM_LAYERS, 1, HIDDEN), jnp.float32),
        "w_out": scale_out * jax.random.normal(
            k3, (HIDDEN, OUT_CHANNELS), jnp.float32),
    }
    return params


# ----------------------------- pure-JAX reference ---------------------------
def reference_forward(x, rbf, i, params, *, num_nodes, num_layers):
    g = (rbf @ params["w_rbf"]) * x
    h = jax.ops.segment_sum(g, i, num_segments=num_nodes)
    for layer in range(num_layers):
        h = _silu(h @ params["w_lins"][layer] + params["b_lins"][layer])
    return h @ params["w_out"]


if __name__ == "__main__":
    key = jax.random.PRNGKey(0)
    kx, krbf, ki, kp = jax.random.split(key, 4)

    x = jax.random.normal(kx, (NUM_EDGES, HIDDEN), jnp.float32)
    rbf = jax.random.normal(krbf, (NUM_EDGES, NUM_RADIAL), jnp.float32)
    i = jax.random.randint(ki, (NUM_EDGES,), 0, NUM_NODES, jnp.int32)
    params = init_params(kp)

    out = output_block_forward(x, rbf, i, params,
                               num_nodes=NUM_NODES, num_layers=NUM_LAYERS)
    out = jax.block_until_ready(out)

    ref = reference_forward(x, rbf, i, params,
                            num_nodes=NUM_NODES, num_layers=NUM_LAYERS)
    assert out.shape == (NUM_NODES, OUT_CHANNELS)
    assert jnp.allclose(out, ref, atol=1e-3, rtol=1e-3), "mismatch vs reference"
    print("KERNEL_OK")
</pallas_src>

<mosaic_0001>
module attributes {stable_mosaic.version = 11 : i64} {
  func.func @output_block_kernel(%arg0: i32, %arg1: memref<512x32xf32, #tpu.memory_space<vmem>>, %arg2: memref<512x6xf32, #tpu.memory_space<vmem>>, %arg3: memref<1x512xi32, #tpu.memory_space<vmem>>, %arg4: memref<6x32xf32, #tpu.memory_space<vmem>>, %arg5: memref<2x32x32xf32, #tpu.memory_space<vmem>>, %arg6: memref<2x1x32xf32, #tpu.memory_space<vmem>>, %arg7: memref<32x16xf32, #tpu.memory_space<vmem>>, %arg8: memref<64x16xf32, #tpu.memory_space<vmem>>, %arg9: memref<64x32xf32, #tpu.memory_space<vmem>>) attributes {dimension_semantics = [#tpu.dimension_semantics<arbitrary>], iteration_bounds = array<i64: 1>, scalar_prefetch = 0 : i64, scratch_operands = 1 : i64, tpu.core_type = #tpu.core_type<tc>, window_params = [{transform_indices = @transform_0, window_bounds = array<i64: 512, 32>}, {transform_indices = @transform_1, window_bounds = array<i64: 512, 6>}, {transform_indices = @transform_2, window_bounds = array<i64: 1, 512>}, {pipeline_mode = #tpu.pipeline_mode<synchronous>, transform_indices = @transform_3, window_bounds = array<i64: 6, 32>}, {pipeline_mode = #tpu.pipeline_mode<synchronous>, transform_indices = @transform_4, window_bounds = array<i64: 2, 32, 32>}, {pipeline_mode = #tpu.pipeline_mode<synchronous>, transform_indices = @transform_5, window_bounds = array<i64: 2, 1, 32>}, {pipeline_mode = #tpu.pipeline_mode<synchronous>, transform_indices = @transform_6, window_bounds = array<i64: 32, 16>}, {pipeline_mode = #tpu.pipeline_mode<synchronous>, transform_indices = @transform_7, window_bounds = array<i64: 64, 16>}]} {
    %c0_i32 = arith.constant 0 : i32
    %0 = arith.cmpi eq, %arg0, %c0_i32 : i32
    %1 = arith.extui %0 : i1 to i32
    %c0_i32_0 = arith.constant 0 : i32
    %2 = arith.cmpi ne, %1, %c0_i32_0 : i32
    scf.if %2 {
      %cst_18 = arith.constant 0.000000e+00 : f32
      %38 = vector.broadcast %cst_18 : f32 to vector<64x32xf32>
      %c0_19 = arith.constant 0 : index
      %c0_20 = arith.constant 0 : index
      %39 = vector.load %arg9[%c0_19, %c0_20] : memref<64x32xf32, #tpu.memory_space<vmem>>, vector<64x32xf32>
      tpu.vector_store %arg9[%c0_19, %c0_20], %38 {strides = array<i32>} : memref<64x32xf32, #tpu.memory_space<vmem>>, vector<64x32xf32>,
    } else {
    }
    %c512_i32 = arith.constant 512 : i32
    %3 = arith.muli %arg0, %c512_i32 : i32
    %4 = tpu.iota {dimensions = array<i32: 0>} : vector<512x1xi32>
    %5 = vector.broadcast %3 : i32 to vector<512x1xi32>
    %6 = arith.addi %5, %4 : vector<512x1xi32>
    %c512_i32_1 = arith.constant 512 : i32
    %7 = vector.broadcast %c512_i32_1 : i32 to vector<512x1xi32>
    %8 = arith.cmpi slt, %6, %7 : vector<512x1xi32>
    %9 = tpu.iota {dimensions = array<i32: 1>} : vector<1x512xi32>
    %10 = vector.broadcast %3 : i32 to vector<1x512xi32>
    %11 = arith.addi %10, %9 : vector<1x512xi32>
    %c512_i32_2 = arith.constant 512 : i32
    %12 = vector.broadcast %c512_i32_2 : i32 to vector<1x512xi32>
    %13 = arith.cmpi slt, %11, %12 : vector<1x512xi32>
    %c0 = arith.constant 0 : index
    %c0_3 = arith.constant 0 : index
    %14 = vector.load %arg2[%c0, %c0_3] : memref<512x6xf32, #tpu.memory_space<vmem>>, vector<512x6xf32>
    %c0_4 = arith.constant 0 : index
    %c0_5 = arith.constant 0 : index
    %15 = vector.load %arg4[%c0_4, %c0_5] : memref<6x32xf32, #tpu.memory_space<vmem>>, vector<6x32xf32>
    %cst = arith.constant dense<0.000000e+00> : vector<512x32xf32>
    %16 = tpu.matmul %14, %15, %cst {dimension_numbers = #tpu.dot_dimension_numbers<[1], [0], [0], [1], [0, 0, 1, 1], [], []>} : vector<512x6xf32>, vector<6x32xf32>, vector<512x32xf32> -> vector<512x32xf32>
    %c0_6 = arith.constant 0 : index
    %c0_7 = arith.constant 0 : index
    %17 = vector.load %arg1[%c0_6, %c0_7] : memref<512x32xf32, #tpu.memory_space<vmem>>, vector<512x32xf32>
    %18 = arith.mulf %16, %17 : vector<512x32xf32>
    %cst_8 = arith.constant 0.000000e+00 : f32
    %19 = vector.shape_cast %8 : vector<512x1xi1> to vector<512x1xi1>
    %20 = vector.broadcast %19 : vector<512x1xi1> to vector<512x32xi1>
    %21 = vector.broadcast %cst_8 : f32 to vector<512x32xf32>
    %22 = arith.select %20, %18, %21 : vector<512x32xi1>, vector<512x32xf32>
    %c0_9 = arith.constant 0 : index
    %c0_10 = arith.constant 0 : index
    %23 = vector.load %arg3[%c0_9, %c0_10] : memref<1x512xi32, #tpu.memory_space<vmem>>, vector<1x512xi32>
    %24 = tpu.iota {dimensions = array<i32: 0>} : vector<64x512xi32>
    %25 = vector.broadcast %23 : vector<1x512xi32> to vector<64x512xi32>
    %26 = arith.cmpi eq, %24, %25 : vector<64x512xi32>
    %27 = vector.broadcast %13 : vector<1x512xi1> to vector<64x512xi1>
    %28 = arith.andi %26, %27 : vector<64x512xi1>
    %29 = arith.extui %28 : vector<64x512xi1> to vector<64x512xi32>
    %30 = arith.sitofp %29 : vector<64x512xi32> to vector<64x512xf32>
    %c0_11 = arith.constant 0 : index
    %c0_12 = arith.constant 0 : index
    %31 = vector.load %arg9[%c0_11, %c0_12] : memref<64x32xf32, #tpu.memory_space<vmem>>, vector<64x32xf32>
    %cst_13 = arith.constant dense<0.000000e+00> : vector<64x32xf32>
    %32 = tpu.matmul %30, %22, %cst_13 {dimension_numbers = #tpu.dot_dimension_numbers<[1], [0], [0], [1], [0, 0, 1, 1], [], []>} : vector<64x512xf32>, vector<512x32xf32>, vector<64x32xf32> -> vector<64x32xf32>
    %33 = arith.addf %31, %32 : vector<64x32xf32>
    %c0_14 = arith.constant 0 : index
    %c0_15 = arith.constant 0 : index
    %34 = vector.load %arg9[%c0_14, %c0_15] : memref<64x32xf32, #tpu.memory_space<vmem>>, vector<64x32xf32>
    tpu.vector_store %arg9[%c0_14, %c0_15], %33 {strides = array<i32>} : memref<64x32xf32, #tpu.memory_space<vmem>>, vector<64x32xf32>,
    %c0_i32_16 = arith.constant 0 : i32
    %35 = arith.cmpi eq, %arg0, %c0_i32_16 : i32
    %36 = arith.extui %35 : i1 to i32
    %c0_i32_17 = arith.constant 0 : i32
    %37 = arith.cmpi ne, %36, %c0_i32_17 : i32
    scf.if %37 {
      %c0_18 = arith.constant 0 : index
      %c0_19 = arith.constant 0 : index
      %38 = vector.load %arg9[%c0_18, %c0_19] : memref<64x32xf32, #tpu.memory_space<vmem>>, vector<64x32xf32>
      %c0_20 = arith.constant 0 : index
      %c0_21 = arith.constant 0 : index
      %c0_22 = arith.constant 0 : index
      %39 = vector.load %arg5[%c0_20, %c0_21, %c0_22] : memref<2x32x32xf32, #tpu.memory_space<vmem>>, vector<1x32x32xf32>
      %40 = vector.shape_cast %39 : vector<1x32x32xf32> to vector<32x32xf32>
      %cst_23 = arith.constant dense<0.000000e+00> : vector<64x32xf32>
      %41 = tpu.matmul %38, %40, %cst_23 {dimension_numbers = #tpu.dot_dimension_numbers<[1], [0], [0], [1], [0, 0, 1, 1], [], []>} : vector<64x32xf32>, vector<32x32xf32>, vector<64x32xf32> -> vector<64x32xf32>
      %c0_24 = arith.constant 0 : index
      %c0_25 = arith.constant 0 : index
      %c0_26 = arith.constant 0 : index
      %42 = vector.load %arg6[%c0_24, %c0_25, %c0_26] : memref<2x1x32xf32, #tpu.memory_space<vmem>>, vector<1x1x32xf32>
      %43 = vector.shape_cast %42 : vector<1x1x32xf32> to vector<1x32xf32>
      %44 = vector.broadcast %43 : vector<1x32xf32> to vector<64x32xf32>
      %45 = arith.addf %41, %44 : vector<64x32xf32>
      %46 = arith.negf %45 : vector<64x32xf32>
      %47 = math.exp %46 : vector<64x32xf32>
      %cst_27 = arith.constant 1.000000e+00 : f32
      %48 = vector.broadcast %cst_27 : f32 to vector<64x32xf32>
      %49 = arith.addf %48, %47 : vector<64x32xf32>
      %50 = arith.divf %48, %49 : vector<64x32xf32>
      %51 = arith.mulf %45, %50 : vector<64x32xf32>
      %c1 = arith.constant 1 : index
      %c0_28 = arith.constant 0 : index
      %c0_29 = arith.constant 0 : index
      %52 = vector.load %arg5[%c1, %c0_28, %c0_29] : memref<2x32x32xf32, #tpu.memory_space<vmem>>, vector<1x32x32xf32>
      %53 = vector.shape_cast %52 : vector<1x32x32xf32> to vector<32x32xf32>
      %cst_30 = arith.constant dense<0.000000e+00> : vector<64x32xf32>
      %54 = tpu.matmul %51, %53, %cst_30 {dimension_numbers = #tpu.dot_dimension_numbers<[1], [0], [0], [1], [0, 0, 1, 1], [], []>} : vector<64x32xf32>, vector<32x32xf32>, vector<64x32xf32> -> vector<64x32xf32>
      %c1_31 = arith.constant 1 : index
      %c0_32 = arith.constant 0 : index
      %c0_33 = arith.constant 0 : index
      %55 = vector.load %arg6[%c1_31, %c0_32, %c0_33] : memref<2x1x32xf32, #tpu.memory_space<vmem>>, vector<1x1x32xf32>
      %56 = vector.shape_cast %55 : vector<1x1x32xf32> to vector<1x32xf32>
      %57 = vector.broadcast %56 : vector<1x32xf32> to vector<64x32xf32>
      %58 = arith.addf %54, %57 : vector<64x32xf32>
      %59 = arith.negf %58 : vector<64x32xf32>
      %60 = math.exp %59 : vector<64x32xf32>
      %cst_34 = arith.constant 1.000000e+00 : f32
      %61 = vector.broadcast %cst_34 : f32 to vector<64x32xf32>
      %62 = arith.addf %61, %60 : vector<64x32xf32>
      %63 = arith.divf %61, %62 : vector<64x32xf32>
      %64 = arith.mulf %58, %63 : vector<64x32xf32>
      %c0_35 = arith.constant 0 : index
      %c0_36 = arith.constant 0 : index
      %65 = vector.load %arg7[%c0_35, %c0_36] : memref<32x16xf32, #tpu.memory_space<vmem>>, vector<32x16xf32>
      %cst_37 = arith.constant dense<0.000000e+00> : vector<64x16xf32>
      %66 = tpu.matmul %64, %65, %cst_37 {dimension_numbers = #tpu.dot_dimension_numbers<[1], [0], [0], [1], [0, 0, 1, 1], [], []>} : vector<64x32xf32>, vector<32x16xf32>, vector<64x16xf32> -> vector<64x16xf32>
      %c0_38 = arith.constant 0 : index
      %c0_39 = arith.constant 0 : index
      %67 = vector.load %arg8[%c0_38, %c0_39] : memref<64x16xf32, #tpu.memory_space<vmem>>, vector<64x16xf32>
      tpu.vector_store %arg8[%c0_38, %c0_39], %66 {strides = array<i32>} : memref<64x16xf32, #tpu.memory_space<vmem>>, vector<64x16xf32>,
    } else {
    }
    return
  }
  func.func @transform_0(%arg0: i32) -> (i32, i32) {
    %c0_i32 = arith.constant 0 : i32
    %c0_i32_0 = arith.constant 0 : i32
    return %arg0, %c0_i32 : i32, i32
  }
  func.func @transform_1(%arg0: i32) -> (i32, i32) {
    %c0_i32 = arith.constant 0 : i32
    %c0_i32_0 = arith.constant 0 : i32
    return %arg0, %c0_i32 : i32, i32
  }
  func.func @transform_2(%arg0: i32) -> (i32, i32) {
    %c0_i32 = arith.constant 0 : i32
    %c0_i32_0 = arith.constant 0 : i32
    return %c0_i32, %arg0 : i32, i32
  }
  func.func @transform_3(%arg0: i32) -> (i32, i32) {
    %c0_i32 = arith.constant 0 : i32
    %c0_i32_0 = arith.constant 0 : i32
    %c0_i32_1 = arith.constant 0 : i32
    return %c0_i32, %c0_i32_0 : i32, i32
  }
  func.func @transform_4(%arg0: i32) -> (i32, i32, i32) {
    %c0_i32 = arith.constant 0 : i32
    %c0_i32_0 = arith.constant 0 : i32
    %c0_i32_1 = arith.constant 0 : i32
    %c0_i32_2 = arith.constant 0 : i32
    return %c0_i32, %c0_i32_0, %c0_i32_1 : i32, i32, i32
  }
  func.func @transform_5(%arg0: i32) -> (i32, i32, i32) {
    %c0_i32 = arith.constant 0 : i32
    %c0_i32_0 = arith.constant 0 : i32
    %c0_i32_1 = arith.constant 0 : i32
    %c0_i32_2 = arith.constant 0 : i32
    return %c0_i32, %c0_i32_0, %c0_i32_1 : i32, i32, i32
  }
  func.func @transform_6(%arg0: i32) -> (i32, i32) {
    %c0_i32 = arith.constant 0 : i32
    %c0_i32_0 = arith.constant 0 : i32
    %c0_i32_1 = arith.constant 0 : i32
    return %c0_i32, %c0_i32_0 : i32, i32
  }
  func.func @transform_7(%arg0: i32) -> (i32, i32) {
    %c0_i32 = arith.constant 0 : i32
    %c0_i32_0 = arith.constant 0 : i32
    %c0_i32_1 = arith.constant 0 : i32
    return %c0_i32, %c0_i32_0 : i32, i32
  }
}

</mosaic_0001>

<bundles_post_ra>
// kernel: tpu_custom_call.1
= control target key start
LH: loop header
LB: loop body
LE: loop exit
PB: predicated region body
PF: predicated region fallthrough
CT: control target
= control target key end

     0   :  { %vm505_vm0 = vcmask 1045504   ;;  %vm312_vm1 = vcmask 48128   ;;  %s3764_s3 = inlined_call_operand.vmem [shape: f32[6,32], index: 3, kind: input, shape index: {}]   ;;  %s3765_s1 = inlined_call_operand.vmem [shape: f32[512,6], index: 1, kind: input, shape index: {}]   ;;  %s3766_s2 = inlined_call_operand.vmem [shape: s32[1,512], index: 2, kind: input, shape index: {}]   ;;  %s3767_s0 = inlined_call_operand.vmem [shape: f32[512,32], index: 0, kind: input, shape index: {}]   ;;  %s3768_s4 = inlined_call_operand.vmem [shape: f32[2,32,32], index: 4, kind: input, shape index: {}]   ;;  %s3769_s5 = inlined_call_operand.vmem [shape: f32[2,1,32], index: 5, kind: input, shape index: {}]   ;;  %s3770_s6 = inlined_call_operand.vmem [shape: f32[32,16], index: 6, kind: input, shape index: {}]   ;;  %s3771_s7 = inlined_call_operand.vmem [shape: f32[64,16], index: 7, kind: output, shape index: {}]  }
   0x1   :  { %v311_v0 = vld [vmem:[%s3764_s3] sm:$0x3f]  ;;  %v248_v2 = vld [vmem:[%s3765_s1 + $0x8] sm:$0xff]  ;;  %v249_v3 = vld [vmem:[%s3765_s1 + $0x10] sm:$0xff] }
   0x2   :  { %v247_v1 = vld [vmem:[%s3765_s1] sm:$0xff]  ;;  %2542 = vmatprep.subr.msk.mxu0 %vm505_vm0, %v311_v0  ;;  %v250_v4 = vld [vmem:[%s3765_s1 + $0x18] sm:$0xff]  ;;  %v252_v6 = vld [vmem:[%s3765_s1 + $0x28] sm:$0xff] }
   0x3   :  { %2544 = vmatprep.mubr.msk.f32.mxu0 %vm312_vm1, %v247_v1  ;;  %2543 = vmatpush3.msk.msra.mxu0 %vm505_vm0, %v311_v0  ;;  %v251_v5 = vld [vmem:[%s3765_s1 + $0x20] sm:$0xff]  ;;  %v253_v7 = vld [vmem:[%s3765_s1 + $0x30] sm:$0xff]  ;;  %v254_v8 = vld [vmem:[%s3765_s1 + $0x38] sm:$0xff]  ;;  %v40_v1 = vlaneseq }
   0x4   :  { %2545 = vmatmul.mubr.msk.f32.vlgmr.msra.gmra.mxu0 %vm312_vm1, %v248_v2  ;;  %v255_v9 = vld [vmem:[%s3765_s1 + $0x40] sm:$0xff]  ;;  %v256_v10 = vld [vmem:[%s3765_s1 + $0x48] sm:$0xff]  ;;  %v257_v11 = vld [vmem:[%s3765_s1 + $0x50] sm:$0xff] }
   0x5   :  { %2547 = vmatprep.mubr.msk.f32.mxu0 %vm312_vm1, %v249_v3  ;;  %v258_v12 = vld [vmem:[%s3765_s1 + $0x58] sm:$0xff]  ;;  %v259_v13 = vld [vmem:[%s3765_s1 + $0x60] sm:$0xff]  ;;  %v260_v14 = vld [vmem:[%s3765_s1 + $0x68] sm:$0xff]  ;;  %v3075_v2 = vshrl.u32 %v40_v1, 7 }
   0x6   :  { %v261_v15 = vld [vmem:[%s3765_s1 + $0x70] sm:$0xff]  ;;  %v262_v16 = vld [vmem:[%s3765_s1 + $0x78] sm:$0xff]  ;;  %v263_v17 = vld [vmem:[%s3765_s1 + $0x80] sm:$0xff] }
   0x7   :  { %v264_v18 = vld [vmem:[%s3765_s1 + $0x88] sm:$0xff]  ;;  %v265_v19 = vld [vmem:[%s3765_s1 + $0x90] sm:$0xff]  ;;  %v266_v20 = vld [vmem:[%s3765_s1 + $0x98] sm:$0xff]  ;;  %v1221_v3 = vsub.s32 1, %v3075_v2 }
   0x8   :  { %2548 = vmatmul.mubr.msk.f32.gmra.mxu0 %vm312_vm1, %v250_v4  ;;  %v267_v21 = vld [vmem:[%s3765_s1 + $0xa0] sm:$0xff]  ;;  %v268_v22 = vld [vmem:[%s3765_s1 + $0xa8] sm:$0xff]  ;;  %v269_v23 = vld [vmem:[%s3765_s1 + $0xb0] sm:$0xff] }
   0x9   :  { %2550 = vmatprep.mubr.msk.f32.mxu0 %vm312_vm1, %v251_v5  ;;  %v270_v24 = vld [vmem:[%s3765_s1 + $0xb8] sm:$0xff]  ;;  %v271_v25 = vld [vmem:[%s3765_s1 + $0xc0] sm:$0xff]  ;;  %v272_v26 = vld [vmem:[%s3765_s1 + $0xc8] sm:$0xff]  ;;  %v1217_v5 = vsub.s32 0, %v3075_v2 }
   0xa   :  { %v273_v27 = vld [vmem:[%s3765_s1 + $0xd0] sm:$0xff]  ;;  %v274_v28 = vld [vmem:[%s3765_s1 + $0xd8] sm:$0xff]  ;;  %v275_v29 = vld [vmem:[%s3765_s1 + $0xe0] sm:$0xff] }
   0xb   :  { %v276_v30 = vld [vmem:[%s3765_s1 + $0xe8] sm:$0xff]  ;;  %v277_v31 = vld [vmem:[%s3765_s1 + $0xf0] sm:$0xff]  ;;  %v278_v32 = vld [vmem:[%s3765_s1 + $0xf8] sm:$0xff] }
   0xc   :  { %2551 = vmatmul.mubr.msk.f32.gmra.mxu0 %vm312_vm1, %v252_v6  ;;  %v279_v33 = vld [vmem:[%s3765_s1 + $0x100] sm:$0xff]  ;;  %v280_v34 = vld [vmem:[%s3765_s1 + $0x108] sm:$0xff]  ;;  %v281_v35 = vld [vmem:[%s3765_s1 + $0x110] sm:$0xff] }
   0xd   :  { %2553 = vmatprep.mubr.msk.f32.mxu0 %vm312_vm1, %v253_v7  ;;  %v282_v36 = vld [vmem:[%s3765_s1 + $0x118] sm:$0xff]  ;;  %v283_v37 = vld [vmem:[%s3765_s1 + $0x120] sm:$0xff]  ;;  %v284_v38 = vld [vmem:[%s3765_s1 + $0x128] sm:$0xff] }
   0xe   :  { %v285_v39 = vld [vmem:[%s3765_s1 + $0x130] sm:$0xff]  ;;  %v286_v40 = vld [vmem:[%s3765_s1 + $0x138] sm:$0xff]  ;;  %v287_v41 = vld [vmem:[%s3765_s1 + $0x140] sm:$0xff] }
   0xf   :  { %v288_v42 = vld [vmem:[%s3765_s1 + $0x148] sm:$0xff]  ;;  %v289_v43 = vld [vmem:[%s3765_s1 + $0x150] sm:$0xff]  ;;  %v290_v44 = vld [vmem:[%s3765_s1 + $0x158] sm:$0xff] }
  0x10   :  { %2554 = vmatmul.mubr.msk.f32.gmra.mxu0 %vm312_vm1, %v254_v8  ;;  %v291_v45 = vld [vmem:[%s3765_s1 + $0x160] sm:$0xff]  ;;  %v292_v46 = vld [vmem:[%s3765_s1 + $0x168] sm:$0xff]  ;;  %v293_v47 = vld [vmem:[%s3765_s1 + $0x170] sm:$0xff]  ;;  %v2774_v8 = vmov 1.0  }
  0x11   :  { %2556 = vmatprep.mubr.msk.f32.mxu0 %vm312_vm1, %v255_v9  ;;  %v294_v48 = vld [vmem:[%s3765_s1 + $0x178] sm:$0xff]  ;;  %v295_v49 = vld [vmem:[%s3765_s1 + $0x180] sm:$0xff]  ;;  %v296_v50 = vld [vmem:[%s3765_s1 + $0x188] sm:$0xff]  ;;  %v3092_v9 = vadd.s32 8, %v3075_v2 }
  0x12   :  { %v297_v51 = vld [vmem:[%s3765_s1 + $0x190] sm:$0xff]  ;;  %v298_v52 = vld [vmem:[%s3765_s1 + $0x198] sm:$0xff]  ;;  %v299_v53 = vld [vmem:[%s3765_s1 + $0x1a0] sm:$0xff] }
  0x13   :  { %v300_v54 = vld [vmem:[%s3765_s1 + $0x1a8] sm:$0xff]  ;;  %v301_v55 = vld [vmem:[%s3765_s1 + $0x1b0] sm:$0xff]  ;;  %v302_v56 = vld [vmem:[%s3765_s1 + $0x1b8] sm:$0xff] }
  0x14   :  { %2557 = vmatmul.mubr.msk.f32.gmra.mxu0 %vm312_vm1, %v256_v10  ;;  %v303_v57 = vld [vmem:[%s3765_s1 + $0x1c0] sm:$0xff]  ;;  %v304_v58 = vld [vmem:[%s3765_s1 + $0x1c8] sm:$0xff]  ;;  %v305_v59 = vld [vmem:[%s3765_s1 + $0x1d0] sm:$0xff] }
  0x15   :  { %2559 = vmatprep.mubr.msk.f32.mxu0 %vm312_vm1, %v257_v11  ;;  %v306_v60 = vld [vmem:[%s3765_s1 + $0x1d8] sm:$0xff]  ;;  %v307_v61 = vld [vmem:[%s3765_s1 + $0x1e0] sm:$0xff]  ;;  %v308_v62 = vld [vmem:[%s3765_s1 + $0x1e8] sm:$0xff]  ;;  %v3101_v11 = vadd.s32 16, %v3075_v2 }
  0x16   :  { %v309_v63 = vld [vmem:[%s3765_s1 + $0x1f0] sm:$0xff]  ;;  %v310_v0 = vld [vmem:[%s3765_s1 + $0x1f8] sm:$0xff]  ;;  %v1214_v4 = vld [vmem:[%s3766_s2] sm:$0xf] }
  0x17   :  { %v3082_v6 = vrot.slane %v1214_v4, %v1221_v3  ;;  %v3084_v7 = vrot.slane %v1214_v4, %v1217_v5  ;;  %v906_v3 = vld [vmem:[%s3767_s0 + $0x60] sm:$0xff] }
  0x18   :  { %2560 = vmatmul.mubr.msk.f32.gmra.mxu0 %vm312_vm1, %v258_v12 }
  0x19   :  { %2562 = vmatprep.mubr.msk.f32.mxu0 %vm312_vm1, %v259_v13  ;;  %vm1232_vm2 = vcmp.eq.s32.totalorder %v3075_v2, %v3082_v6  ;;  %vm1231_vm3 = vcmp.eq.s32.totalorder %v3075_v2, %v3084_v7  ;;  %vm1236_vm4 = vcmp.eq.s32.totalorder %v3092_v9, %v3082_v6  ;;  %vm1235_vm5 = vcmp.eq.s32.totalorder %v3092_v9, %v3084_v7 }
  0x1a   :  { %2250 = vmatprep.mubr.msk.f32.mxu1 %vm1232_vm2, %v2774_v8  ;;  %vm1240_vm6 = vcmp.eq.s32.totalorder %v3101_v11, %v3082_v6  ;;  %vm1239_vm7 = vcmp.eq.s32.totalorder %v3101_v11, %v3084_v7 }
  0x1c   :  { %2563 = vmatmul.mubr.msk.f32.gmra.mxu0 %vm312_vm1, %v260_v14  ;;  %v3112_v14 = vadd.s32 24, %v3075_v2 }
  0x1d   :  { %2565 = vmatprep.mubr.msk.f32.mxu0 %vm312_vm1, %v261_v15 }
  0x1e   :  { %vm1244_vm8 = vcmp.eq.s32.totalorder %v3112_v14, %v3082_v6  ;;  %vm1243_vm9 = vcmp.eq.s32.totalorder %v3112_v14, %v3084_v7 }
  0x20   :  { %2566 = vmatmul.mubr.msk.f32.gmra.mxu0 %vm312_vm1, %v262_v16 }
  0x21   :  { %2568 = vmatprep.mubr.msk.f32.mxu0 %vm312_vm1, %v263_v17  ;;  %v3123_v17 = vadd.s32 32, %v3075_v2 }
  0x23   :  { %vm1248_vm10 = vcmp.eq.s32.totalorder %v3123_v17, %v3082_v6  ;;  %vm1247_vm11 = vcmp.eq.s32.totalorder %v3123_v17, %v3084_v7 }
  0x24   :  { %2569 = vmatmul.mubr.msk.f32.gmra.mxu0 %vm312_vm1, %v264_v18 }
  0x25   :  { %2571 = vmatprep.mubr.msk.f32.mxu0 %vm312_vm1, %v265_v19 }
  0x28   :  { %2572 = vmatmul.mubr.msk.f32.gmra.mxu0 %vm312_vm1, %v266_v20  ;;  %v3134_v20 = vadd.s32 40, %v3075_v2 }
  0x29   :  { %2574 = vmatprep.mubr.msk.f32.mxu0 %vm312_vm1, %v267_v21 }
  0x2a   :  { %vm1252_vm12 = vcmp.eq.s32.totalorder %v3134_v20, %v3082_v6  ;;  %vm1251_vm13 = vcmp.eq.s32.totalorder %v3134_v20, %v3084_v7 }
  0x2c   :  { %2575 = vmatmul.mubr.msk.f32.gmra.mxu0 %vm312_vm1, %v268_v22 }
  0x2d   :  { %2577 = vmatprep.mubr.msk.f32.mxu0 %vm312_vm1, %v269_v23  ;;  %v3145_v23 = vadd.s32 48, %v3075_v2 }
  0x30   :  { %2578 = vmatmul.mubr.msk.f32.gmra.mxu0 %vm312_vm1, %v270_v24 }
  0x31   :  { %2580 = vmatprep.mubr.msk.f32.mxu0 %vm312_vm1, %v271_v25 }
  0x34   :  { %2581 = vmatmul.mubr.msk.f32.gmra.mxu0 %vm312_vm1, %v272_v26  ;;  %v3156_v26 = vadd.s32 56, %v3075_v2 }
  0x35   :  { %2583 = vmatprep.mubr.msk.f32.mxu0 %vm312_vm1, %v273_v27 }
  0x38   :  { %2584 = vmatmul.mubr.msk.f32.gmra.mxu0 %vm312_vm1, %v274_v28 }
  0x39   :  { %2586 = vmatprep.mubr.msk.f32.mxu0 %vm312_vm1, %v275_v29  ;;  %v1229_v29 = vsub.s32 3, %v3075_v2 }
  0x3c   :  { %2587 = vmatmul.mubr.msk.f32.gmra.mxu0 %vm312_vm1, %v276_v30 }
  0x3d   :  { %2589 = vmatprep.mubr.msk.f32.mxu0 %vm312_vm1, %v277_v31  ;;  %v1225_v31 = vsub.s32 2, %v3075_v2 }
  0x40   :  { %2590 = vmatmul.mubr.msk.f32.gmra.mxu0 %vm312_vm1, %v278_v32  ;;  %v3170_v32 = vrot.slane %v1214_v4, %v1229_v29  ;;  %v921_v29 = vld [vmem:[%s3767_s0 + $0xd8] sm:$0xff] }
  0x41   :  { %2592 = vmatprep.mubr.msk.f32.mxu0 %vm312_vm1, %v279_v33 }
  0x42   :  { %vm1258_vm14 = vcmp.eq.s32.totalorder %v3145_v23, %v3170_v32  ;;  %vm1262_vm2 = vcmp.eq.s32.totalorder %v3156_v26, %v3170_v32 }
  0x44   :  { %2593 = vmatmul.mubr.msk.f32.gmra.mxu0 %vm312_vm1, %v280_v34  ;;  %v3172_v34 = vrot.slane %v1214_v4, %v1225_v31 }
  0x45   :  { %2595 = vmatprep.mubr.msk.f32.mxu0 %vm312_vm1, %v281_v35 }
  0x46   :  { %vm1253_vm15 = vcmp.eq.s32.totalorder %v3134_v20, %v3172_v34  ;;  %vm1257_vm0 = vcmp.eq.s32.totalorder %v3145_v23, %v3172_v34 }
  0x48   :  { %2596 = vmatmul.mubr.msk.f32.gmra.mxu0 %vm312_vm1, %v282_v36 }
  0x49   :  { %2598 = vmatprep.mubr.msk.f32.mxu0 %vm312_vm1, %v283_v37 }
  0x4c   :  { %2599 = vmatmul.mubr.msk.f32.gmra.mxu0 %vm312_vm1, %v284_v38 }
  0x4d   :  { %2601 = vmatprep.mubr.msk.f32.mxu0 %vm312_vm1, %v285_v39 }
  0x50   :  { %2602 = vmatmul.mubr.msk.f32.gmra.mxu0 %vm312_vm1, %v286_v40 }
  0x51   :  { %2604 = vmatprep.mubr.msk.f32.mxu0 %vm312_vm1, %v287_v41 }
  0x54   :  { %2605 = vmatmul.mubr.msk.f32.gmra.mxu0 %vm312_vm1, %v288_v42 }
  0x55   :  { %2607 = vmatprep.mubr.msk.f32.mxu0 %vm312_vm1, %v289_v43 }
  0x58   :  { %2608 = vmatmul.mubr.msk.f32.gmra.mxu0 %vm312_vm1, %v290_v44 }
  0x59   :  { %2610 = vmatprep.mubr.msk.f32.mxu0 %vm312_vm1, %v291_v45 }
  0x5c   :  { %2611 = vmatmul.mubr.msk.f32.gmra.mxu0 %vm312_vm1, %v292_v46 }
  0x5d   :  { %2613 = vmatprep.mubr.msk.f32.mxu0 %vm312_vm1, %v293_v47 }
  0x60   :  { %2614 = vmatmul.mubr.msk.f32.gmra.mxu0 %vm312_vm1, %v294_v48 }
  0x61   :  { %2616 = vmatprep.mubr.msk.f32.mxu0 %vm312_vm1, %v295_v49 }
  0x64   :  { %2617 = vmatmul.mubr.msk.f32.gmra.mxu0 %vm312_vm1, %v296_v50  ;;  %v925_v50 = vld [vmem:[%s3767_s0 + $0xf8] sm:$0xff] }
  0x65   :  { %2619 = vmatprep.mubr.msk.f32.mxu0 %vm312_vm1, %v297_v51  ;;  %v909_v51 = vld [vmem:[%s3767_s0 + $0x78] sm:$0xff] }
  0x68   :  { %2620 = vmatmul.mubr.msk.f32.gmra.mxu0 %vm312_vm1, %v298_v52 }
  0x69   :  { %2622 = vmatprep.mubr.msk.f32.mxu0 %vm312_vm1, %v299_v53  ;;  %v924_v53 = vld [vmem:[%s3767_s0 + $0xf0] sm:$0xff] }
  0x6c   :  { %2623 = vmatmul.mubr.msk.f32.gmra.mxu0 %vm312_vm1, %v300_v54  ;;  %v3238_v54 = vld [vmem:[%s3768_s4 + $0x18] sm:$0xff] }
  0x6d   :  { %2625 = vmatprep.mubr.msk.f32.mxu0 %vm312_vm1, %v301_v55  ;;  %v3243_v55 = vld [vmem:[%s3768_s4 + $0x10] sm:$0xff]  ;;  %2640 = vmatprep.subr.mxu0 %v3238_v54 }
  0x6e   :  { %2641 = vmatpush3.msra.mxu0 %v3238_v54 }
  0x6f   :  { %2642 = vmatprep.subr.mxu0 %v3243_v55 }
  0x70   :  { %2626 = vmatmul.mubr.msk.f32.gmra.mxu0 %vm312_vm1, %v302_v56  ;;  %v908_v56 = vld [vmem:[%s3767_s0 + $0x70] sm:$0xff] }
  0x71   :  { %2628 = vmatprep.mubr.msk.f32.mxu0 %vm312_vm1, %v303_v57  ;;  %2643 = vmatpush3.msra.mxu0 %v3243_v55 }
  0x74   :  { %2629 = vmatmul.mubr.msk.f32.gmra.mxu0 %vm312_vm1, %v304_v58 }
  0x75   :  { %2631 = vmatprep.mubr.msk.f32.mxu0 %vm312_vm1, %v305_v59  ;;  %v923_v59 = vld [vmem:[%s3767_s0 + $0xe8] sm:$0xff] }
  0x78   :  { %2632 = vmatmul.mubr.msk.f32.gmra.mxu0 %vm312_vm1, %v306_v60 }
  0x79   :  { %2634 = vmatprep.mubr.msk.f32.mxu0 %vm312_vm1, %v307_v61  ;;  %v907_v61 = vld [vmem:[%s3767_s0 + $0x68] sm:$0xff] }
  0x7c   :  { %2635 = vmatmul.mubr.msk.f32.gmra.mxu0 %vm312_vm1, %v308_v62 }
  0x7d   :  { %2637 = vmatprep.mubr.msk.f32.mxu0 %vm312_vm1, %v309_v63 }
  0x80   :  { %2638 = vmatmul.mubr.msk.f32.gmra.mxu0 %vm312_vm1, %v310_v0  ;;  %vm1261_vm1 = vcmp.eq.s32.totalorder %v3156_v26, %v3172_v34  ;;  %v922_v0 = vld [vmem:[%s3767_s0 + $0xe0] sm:$0xff] }
  0xc4   :  { %v3096_v10 = vpop.f32.mrf.mxu0 }
  0xc6   :  { %v3103_v12 = vpop.f32.mrf.mxu0 }
  0xc8   :  { %v3107_v13 = vpop.f32.mrf.mxu0 }
  0xca   :  { %v3114_v15 = vpop.f32.mrf.mxu0 }
  0xcc   :  { %v3118_v16 = vpop.f32.mrf.mxu0 }
  0xce   :  { %v3125_v18 = vpop.f32.mrf.mxu0 }
  0xd0   :  { %v3129_v19 = vpop.f32.mrf.mxu0 }
  0xd2   :  { %v3136_v21 = vpop.f32.mrf.mxu0 }
  0xd4   :  { %v3140_v22 = vpop.f32.mrf.mxu0 }
  0xd6   :  { %v3147_v24 = vpop.f32.mrf.mxu0 }
  0xd8   :  { %v3151_v25 = vpop.f32.mrf.mxu0 }
  0xda   :  { %v3158_v27 = vpop.f32.mrf.mxu0 }
  0xdc   :  { %v3162_v28 = vpop.f32.mrf.mxu0 }
  0xdd   :  { %v971_v5 = vmul.f32 %v3162_v28, %v907_v61 }
  0xde   :  { %v3167_v30 = vpop.f32.mrf.mxu0 }
  0xe0   :  { %v2567_v33 = vpop.f32.mrf.mxu0 }
  0xe1   :  { %v973_v58 = vmul.f32 %v2567_v33, %v909_v51  ;;  %v905_v33 = vld [vmem:[%s3767_s0 + $0x58] sm:$0xff]  ;;  %v904_v51 = vld [vmem:[%s3767_s0 + $0x50] sm:$0xff] }
  0xe2   :  { %v645_v35 = vpop.f32.mrf.mxu0 }
  0xe3   :  { %v972_v63 = vmul.f32 %v908_v56, %v645_v35  ;;  %v903_v56 = vld [vmem:[%s3767_s0 + $0x48] sm:$0xff] }
  0xe4   :  { %v3180_v36 = vpop.f32.mrf.mxu0  ;;  %v967_v61 = vmul.f32 %v3140_v22, %v903_v56  ;;  %v916_v22 = vld [vmem:[%s3767_s0 + $0xb0] sm:$0xff] }
  0xe5   :  { %v896_v56 = vld [vmem:[%s3767_s0 + $0x10] sm:$0xff] }
  0xe6   :  { %v3184_v37 = vpop.f32.mrf.mxu0 }
  0xe8   :  { %v3188_v38 = vpop.f32.mrf.mxu0 }
  0xea   :  { %v3192_v39 = vpop.f32.mrf.mxu0 }
  0xec   :  { %v3196_v40 = vpop.f32.mrf.mxu0 }
  0xee   :  { %v3200_v41 = vpop.f32.mrf.mxu0 }
  0xf0   :  { %v3204_v42 = vpop.f32.mrf.mxu0 }
  0xf2   :  { %v3208_v43 = vpop.f32.mrf.mxu0 }
  0xf4   :  { %v3212_v44 = vpop.f32.mrf.mxu0 }
  0xf6   :  { %v3216_v45 = vpop.f32.mrf.mxu0 }
  0xf8   :  { %v2585_v46 = vpop.f32.mrf.mxu0 }
  0xfa   :  { %v705_v47 = vpop.f32.mrf.mxu0 }
  0xfc   :  { %v2588_v48 = vpop.f32.mrf.mxu0 }
  0xfd   :  { %v987_v4 = vmul.f32 %v2588_v48, %v923_v59  ;;  %v920_v48 = vld [vmem:[%s3767_s0 + $0xd0] sm:$0xff]  ;;  %v902_v59 = vld [vmem:[%s3767_s0 + $0x40] sm:$0xff] }
  0xfe   :  { %v715_v49 = vpop.f32.mrf.mxu0 }
  0xff   :  { %v986_v35 = vmul.f32 %v922_v0, %v715_v49  ;;  %v919_v49 = vld [vmem:[%s3767_s0 + $0xc8] sm:$0xff]  ;;  %v966_v0 = vmul.f32 %v902_v59, %v3147_v24 }
 0x100   :  { %v2591_v52 = vpop.f32.mrf.mxu0  ;;  %v915_v24 = vld [vmem:[%s3767_s0 + $0xa8] sm:$0xff] }
 0x101   :  { %v989_v57 = vmul.f32 %v2591_v52, %v925_v50  ;;  %v970_v50 = vmul.f32 %v906_v3, %v3167_v30  ;;  %v985_v52 = vmul.f32 %v2585_v46, %v921_v29  ;;  %v918_v46 = vld [vmem:[%s3767_s0 + $0xc0] sm:$0xff]  ;;  %v900_v3 = vld [vmem:[%s3767_s0 + $0x30] sm:$0xff]  ;;  %v899_v29 = vld [vmem:[%s3767_s0 + $0x28] sm:$0xff] }
 0x102   :  { %v725_v60 = vpop.f32.mrf.mxu0 }
 0x103   :  { %v988_v62 = vmul.f32 %v924_v53, %v725_v60  ;;  %2394 = vmatprep.subr.mxu1 %v989_v57  ;;  %v969_v53 = vmul.f32 %v3151_v25, %v905_v33  ;;  %v984_v57 = vmul.f32 %v920_v48, %v705_v47  ;;  %v983_v60 = vmul.f32 %v3212_v44, %v919_v49 }
 0x104   :  { %v3260_v1 = vpop.f32.mrf.mxu0  ;;  %2395 = vmatpush3.msra.mxu1 %v973_v58  ;;  %v968_v58 = vmul.f32 %v904_v51, %v3158_v27  ;;  %v917_v27 = vld [vmem:[%s3767_s0 + $0xb8] sm:$0xff]  ;;  %v980_v33 = vmul.f32 %v916_v22, %v3208_v43  ;;  %v979_v48 = vmul.f32 %v3196_v40, %v915_v24  ;;  %v963_v51 = vmul.f32 %v3118_v16, %v899_v29  ;;  %v912_v16 = vld [vmem:[%s3767_s0 + $0x90] sm:$0xff] }
 0x105   :  { %2396 = vmatprep.subr.mxu1 %v988_v62  ;;  %v901_v62 = vld [vmem:[%s3767_s0 + $0x38] sm:$0xff]  ;;  %v976_v59 = vmul.f32 %v912_v16, %v3192_v39 }
 0x106   :  { %v3270_v31 = vpop.f32.mrf.mxu0  ;;  %2397 = vmatpush3.msra.mxu1 %v972_v63  ;;  %v982_v63 = vmul.f32 %v918_v46, %v3216_v45  ;;  %v895_v46 = vld [vmem:[%s3767_s0 + $0x8] sm:$0xff] }
 0x107   :  { %2398 = vmatprep.subr.mxu1 %v987_v4  ;;  %v981_v4 = vmul.f32 %v3204_v42, %v917_v27 }
 0x108   :  { %v3279_v28 = vpop.f32.mrf.mxu0  ;;  %2399 = vmatpush3.msra.mxu1 %v971_v5  ;;  %v965_v5 = vmul.f32 %v3129_v19, %v901_v62  ;;  %v914_v19 = vld [vmem:[%s3767_s0 + $0xa0] sm:$0xff]  ;;  %v959_v62 = vmul.f32 %v3096_v10, %v895_v46 }
 0x109   :  { %2400 = vmatprep.subr.mxu1 %v986_v35  ;;  %v964_v35 = vmul.f32 %v900_v3, %v3136_v21  ;;  %v913_v21 = vld [vmem:[%s3767_s0 + $0x98] sm:$0xff]  ;;  %v954_v46 = vld [vmem:[%s3767_s0 + $0x1e0] sm:$0xff] }
 0x10a   :  { %v3288_v30 = vpop.f32.mrf.mxu0  ;;  %2401 = vmatpush3.msra.mxu1 %v970_v50  ;;  %v898_v50 = vld [vmem:[%s3767_s0 + $0x20] sm:$0xff] }
 0x10b   :  { %2402 = vmatprep.subr.mxu1 %v985_v52  ;;  %v897_v52 = vld [vmem:[%s3767_s0 + $0x18] sm:$0xff]  ;;  %v962_v49 = vmul.f32 %v898_v50, %v3125_v18  ;;  %v911_v18 = vld [vmem:[%s3767_s0 + $0x88] sm:$0xff] }
 0x10c   :  { %v3297_v25 = vpop.f32.mrf.mxu0  ;;  %2403 = vmatpush3.msra.mxu1 %v969_v53  ;;  %v978_v53 = vmul.f32 %v914_v19, %v3200_v41  ;;  %v975_v27 = vmul.f32 %v3180_v36, %v911_v18 }
 0x10d   :  { %2404 = vmatprep.subr.mxu1 %v984_v57  ;;  %v977_v57 = vmul.f32 %v3188_v38, %v913_v21  ;;  %v941_v21 = vld [vmem:[%s3767_s0 + $0x178] sm:$0xff] }
 0x10e   :  { %v3307_v47 = vpop.f32.mrf.mxu0  ;;  %2405 = vmatpush3.msra.mxu1 %v968_v58  ;;  %v961_v58 = vmul.f32 %v3107_v13, %v897_v52  ;;  %v910_v13 = vld [vmem:[%s3767_s0 + $0x80] sm:$0xff] }
 0x10f   :  { %2406 = vmatprep.subr.mxu1 %v983_v60  ;;  %v960_v60 = vmul.f32 %v896_v56, %v3114_v15  ;;  %v974_v15 = vmul.f32 %v910_v13, %v3184_v37 }
 0x110   :  { %v3317_v44 = vpop.f32.mrf.mxu0  ;;  %2407 = vmatpush3.msra.mxu1 %v967_v61  ;;  %v894_v61 = vld [vmem:[%s3767_s0] sm:$0xff] }
 0x111   :  { %2408 = vmatprep.subr.mxu1 %v982_v63  ;;  %v958_v63 = vmul.f32 %v894_v61, %v3103_v12  ;;  %v953_v61 = vld [vmem:[%s3767_s0 + $0x1d8] sm:$0xff] }
 0x112   :  { %v3327_v45 = vpop.f32.mrf.mxu0  ;;  %2409 = vmatpush3.msra.mxu1 %v966_v0 }
 0x113   :  { %2410 = vmatprep.subr.mxu1 %v981_v4 }
 0x114   :  { %v3337_v42 = vpop.f32.mrf.mxu0  ;;  %2411 = vmatpush3.msra.mxu1 %v965_v5 }
 0x115   :  { %2412 = vmatprep.subr.mxu1 %v980_v33 }
 0x116   :  { %v3347_v43 = vpop.f32.mrf.mxu0  ;;  %2413 = vmatpush3.msra.mxu1 %v964_v35 }
 0x117   :  { %2414 = vmatprep.subr.mxu1 %v979_v48 }
 0x118   :  { %v3357_v40 = vpop.f32.mrf.mxu0  ;;  %2415 = vmatpush3.msra.mxu1 %v963_v51  ;;  %v957_v51 = vld [vmem:[%s3767_s0 + $0x1f8] sm:$0xff] }
 0x119   :  { %2416 = vmatprep.subr.mxu1 %v978_v53  ;;  %v940_v53 = vld [vmem:[%s3767_s0 + $0x170] sm:$0xff] }
 0x11a   :  { %v3367_v41 = vpop.f32.mrf.mxu0  ;;  %2417 = vmatpush3.msra.mxu1 %v962_v49 }
 0x11b   :  { %2418 = vmatprep.subr.mxu1 %v977_v57  ;;  %v939_v57 = vld [vmem:[%s3767_s0 + $0x168] sm:$0xff] }
 0x11c   :  { %v3377_v38 = vpop.f32.mrf.mxu0  ;;  %2419 = vmatpush3.msra.mxu1 %v961_v58 }
 0x11d   :  { %2420 = vmatprep.subr.mxu1 %v976_v59  ;;  %v938_v59 = vld [vmem:[%s3767_s0 + $0x160] sm:$0xff]  ;;  %v1003_v13 = vmul.f32 %v3377_v38, %v939_v57  ;;  %v936_v38 = vld [vmem:[%s3767_s0 + $0x150] sm:$0xff] }
 0x11e   :  { %v3384_v39 = vpop.f32.mrf.mxu0  ;;  %2421 = vmatpush3.msra.mxu1 %v960_v60 }
 0x11f   :  { %2422 = vmatprep.subr.mxu1 %v975_v27  ;;  %v937_v27 = vld [vmem:[%s3767_s0 + $0x158] sm:$0xff] }
 0x120   :  { %v2615_v0 = vpop.f32.mrf.mxu0  ;;  %2423 = vmatpush3.msra.mxu1 %v959_v62 }
 0x121   :  { %2424 = vmatprep.subr.mxu1 %v974_v15  ;;  %v1005_v16 = vmul.f32 %v2615_v0, %v941_v21  ;;  %v1002_v15 = vmul.f32 %v938_v59, %v3384_v39  ;;  %v935_v39 = vld [vmem:[%s3767_s0 + $0x148] sm:$0xff] }
 0x122   :  { %v805_v22 = vpop.f32.mrf.mxu0  ;;  %2425 = vmatpush3.msra.mxu1 %v958_v63  ;;  %v952_v63 = vld [vmem:[%s3767_s0 + $0x1d0] sm:$0xff] }
 0x123   :  { %2251 = vmatmul.mubr.msk.f32.vlgmr.msra.gmra.mxu1 %vm1231_vm3, %v2774_v8  ;;  %vm3772_vm3 = vcmp.eq.s32.totalorder %v3145_v23, %v3082_v6  ;;  %v1004_v18 = vmul.f32 %v940_v53, %v805_v22  ;;  %v1001_v22 = vmul.f32 %v3357_v40, %v937_v27  ;;  %v934_v40 = vld [vmem:[%s3767_s0 + $0x140] sm:$0xff] }
 0x124   :  { %v3392_v36 = vpop.f32.mrf.mxu0  ;;  %2252 = vmatprep.mubr.msk.f32.mxu1 %vm1236_vm4, %v2774_v8  ;;  %vm3773_vm4 = vcmp.eq.s32.totalorder %v3145_v23, %v3084_v7  ;;  %v998_v53 = vmul.f32 %v934_v40, %v3347_v43  ;;  %v931_v43 = vld [vmem:[%s3767_s0 + $0x128] sm:$0xff] }
 0x126   :  { %v3398_v10 = vpop.f32.mrf.mxu0 }
 0x127   :  { %2253 = vmatmul.mubr.msk.f32.gmra.mxu1 %vm1235_vm5, %v2774_v8  ;;  %vm3774_vm5 = vcmp.eq.s32.totalorder %v3156_v26, %v3082_v6  ;;  %v956_v6 = vld [vmem:[%s3767_s0 + $0x1f0] sm:$0xff] }
 0x128   :  { %v3404_v12 = vpop.f32.mrf.mxu0  ;;  %2254 = vmatprep.mubr.msk.f32.mxu1 %vm1240_vm6, %v2774_v8  ;;  %vm3775_vm6 = vcmp.eq.s32.totalorder %v3156_v26, %v3084_v7  ;;  %v955_v7 = vld [vmem:[%s3767_s0 + $0x1e8] sm:$0xff] }
 0x12a   :  { %v3410_v37 = vpop.f32.mrf.mxu0 }
 0x12b   :  { %2255 = vmatmul.mubr.msk.f32.gmra.mxu1 %vm1239_vm7, %v2774_v8  ;;  %vm3776_vm7 = vcmp.eq.s32.totalorder %v3075_v2, %v3170_v32 }
 0x12c   :  { %v3416_v3 = vpop.f32.mrf.mxu0  ;;  %2256 = vmatprep.mubr.msk.f32.mxu1 %vm1244_vm8, %v2774_v8  ;;  %vm3777_vm8 = vcmp.eq.s32.totalorder %v3075_v2, %v3172_v34  ;;  %v2775_v2 = vmov 0.0  }
 0x12e   :  { %v3422_v4 = vpop.f32.mrf.mxu0 }
 0x12f   :  { %2257 = vmatmul.mubr.msk.f32.gmra.mxu1 %vm1243_vm9, %v2774_v8  ;;  %vm3778_vm9 = vcmp.eq.s32.totalorder %v3092_v9, %v3170_v32 }
 0x130   :  { %v3428_v5 = vpop.f32.mrf.mxu0  ;;  %2258 = vmatprep.mubr.msk.f32.mxu1 %vm1248_vm10, %v2774_v8  ;;  %vm3779_vm10 = vcmp.eq.s32.totalorder %v3092_v9, %v3172_v34 }
 0x132   :  { %v3434_v24 = vpop.f32.mrf.mxu0 }
 0x133   :  { %2259 = vmatmul.mubr.msk.f32.gmra.mxu1 %vm1247_vm11, %v2774_v8  ;;  %vm3780_vm11 = vcmp.eq.s32.totalorder %v3101_v11, %v3170_v32 }
 0x134   :  { %v2630_v29 = vpop.f32.mrf.mxu0  ;;  %2260 = vmatprep.mubr.msk.f32.mxu1 %vm1252_vm12, %v2774_v8  ;;  %vm3781_vm12 = vcmp.eq.s32.totalorder %v3101_v11, %v3172_v34 }
 0x136   :  { %v855_v33 = vpop.f32.mrf.mxu0 }
 0x137   :  { %2261 = vmatmul.mubr.msk.f32.gmra.mxu1 %vm1251_vm13, %v2774_v8  ;;  %vm3782_vm13 = vcmp.eq.s32.totalorder %v3112_v14, %v3170_v32 }
 0x138   :  { %v2633_v35 = vpop.f32.mrf.mxu0  ;;  %2262 = vmatprep.mubr.msk.f32.mxu1 %vm3772_vm3, %v2774_v8  ;;  %vm3783_vm3 = vcmp.eq.s32.totalorder %v3112_v14, %v3172_v34 }
 0x139   :  { %v1017_v0 = vmul.f32 %v2633_v35, %v953_v61  ;;  %v950_v35 = vld [vmem:[%s3767_s0 + $0x1c0] sm:$0xff] }
 0x13a   :  { %v865_v19 = vpop.f32.mrf.mxu0 }
 0x13b   :  { %2263 = vmatmul.mubr.msk.f32.gmra.mxu1 %vm3773_vm4, %v2774_v8  ;;  %vm3784_vm4 = vcmp.eq.s32.totalorder %v3123_v17, %v3170_v32 }
 0x13c   :  { %v2636_v50 = vpop.f32.mrf.mxu0  ;;  %2264 = vmatprep.mubr.msk.f32.mxu1 %vm3774_vm5, %v2774_v8  ;;  %vm3785_vm5 = vcmp.eq.s32.totalorder %v3123_v17, %v3172_v34 }
 0x13d   :  { %v1019_v60 = vmul.f32 %v2636_v50, %v955_v7  ;;  %v951_v50 = vld [vmem:[%s3767_s0 + $0x1c8] sm:$0xff] }
 0x13e   :  { %v875_v48 = vpop.f32.mrf.mxu0  ;;  %v1015_v21 = vmul.f32 %v2630_v29, %v951_v50  ;;  %v948_v29 = vld [vmem:[%s3767_s0 + $0x1b0] sm:$0xff] }
 0x13f   :  { %2265 = vmatmul.mubr.msk.f32.gmra.mxu1 %vm3775_vm6, %v2774_v8  ;;  %v1018_v62 = vmul.f32 %v954_v46, %v875_v48  ;;  %v1016_v48 = vmul.f32 %v952_v63, %v865_v19  ;;  %v949_v19 = vld [vmem:[%s3767_s0 + $0x1b8] sm:$0xff]  ;;  %v1012_v7 = vmul.f32 %v948_v29, %v3434_v24  ;;  %vm3786_vm6 = vcmp.eq.s32.totalorder %v3134_v20, %v3170_v32 }
 0x140   :  { %v2639_v52 = vpop.f32.mrf.mxu0  ;;  %2266 = vmatprep.mubr.msk.f32.mxu1 %vm3776_vm7, %v2774_v8  ;;  %v945_v24 = vld [vmem:[%s3767_s0 + $0x198] sm:$0xff] }
 0x141   :  { %v1021_v49 = vmul.f32 %v2639_v52, %v957_v51  ;;  %v1000_v51 = vmul.f32 %v936_v38, %v3367_v41  ;;  %v999_v52 = vmul.f32 %v3337_v42, %v935_v39  ;;  %v933_v41 = vld [vmem:[%s3767_s0 + $0x138] sm:$0xff]  ;;  %v932_v42 = vld [vmem:[%s3767_s0 + $0x130] sm:$0xff]  ;;  %v1009_v59 = vmul.f32 %v3404_v12, %v945_v24  ;;  %v942_v12 = vld [vmem:[%s3767_s0 + $0x180] sm:$0xff] }
 0x142   :  { %v885_v56 = vpop.f32.mrf.mxu0 }
 0x143   :  { %v1020_v58 = vmul.f32 %v956_v6, %v885_v56  ;;  %2450 = vmatprep.subr.mxu1 %v1021_v49  ;;  %v1014_v6 = vmul.f32 %v950_v35, %v855_v33  ;;  %v1013_v49 = vmul.f32 %v3428_v5, %v949_v19  ;;  %v947_v33 = vld [vmem:[%s3767_s0 + $0x1a8] sm:$0xff]  ;;  %v996_v56 = vmul.f32 %v932_v42, %v3327_v45  ;;  %v946_v5 = vld [vmem:[%s3767_s0 + $0x1a0] sm:$0xff]  ;;  %v929_v45 = vld [vmem:[%s3767_s0 + $0x118] sm:$0xff] }
 0x144   :  { %2451 = vmatpush3.msra.mxu1 %v1005_v16  ;;  %v997_v16 = vmul.f32 %v3317_v44, %v933_v41  ;;  %v930_v44 = vld [vmem:[%s3767_s0 + $0x120] sm:$0xff]  ;;  %v1011_v57 = vmul.f32 %v3416_v3, %v947_v33  ;;  %v944_v3 = vld [vmem:[%s3767_s0 + $0x190] sm:$0xff] }
 0x145   :  { %2452 = vmatprep.subr.mxu1 %v1020_v58  ;;  %v995_v58 = vmul.f32 %v3297_v25, %v931_v43  ;;  %v994_v46 = vmul.f32 %v930_v44, %v3307_v47  ;;  %v928_v25 = vld [vmem:[%s3767_s0 + $0x110] sm:$0xff]  ;;  %v927_v47 = vld [vmem:[%s3767_s0 + $0x108] sm:$0xff] }
 0x146   :  { %2453 = vmatpush3.msra.mxu1 %v1004_v18  ;;  %v1010_v18 = vmul.f32 %v946_v5, %v3422_v4  ;;  %v943_v4 = vld [vmem:[%s3767_s0 + $0x188] sm:$0xff]  ;;  %v992_v61 = vmul.f32 %v928_v25, %v3288_v30 }
 0x147   :  { %2454 = vmatprep.subr.mxu1 %v1019_v60  ;;  %v993_v60 = vmul.f32 %v3279_v28, %v929_v45  ;;  %v926_v28 = vld [vmem:[%s3767_s0 + $0x100] sm:$0xff]  ;;  %v1007_v27 = vmul.f32 %v3392_v36, %v943_v4 }
 0x148   :  { %2455 = vmatpush3.msra.mxu1 %v1003_v13  ;;  %v1008_v13 = vmul.f32 %v944_v3, %v3410_v37  ;;  %v1006_v37 = vmul.f32 %v942_v12, %v3398_v10  ;;  %v990_v30 = vmul.f32 %v926_v28, %v3270_v31 }
 0x149   :  { %2456 = vmatprep.subr.mxu1 %v1018_v62  ;;  %v991_v62 = vmul.f32 %v3260_v1, %v927_v47  ;;  %v1614_v1 = vld [vmem:[%s3768_s4 + $0x8] sm:$0xff] }
 0x14a   :  { %2457 = vmatpush3.msra.mxu1 %v1002_v15  ;;  %2644 = vmatprep.subr.mxu0 %v1614_v1 }
 0x14b   :  { %2458 = vmatprep.subr.mxu1 %v1017_v0  ;;  %2645 = vmatpush3.msra.mxu0 %v1614_v1 }
 0x14c   :  { %2459 = vmatpush3.msra.mxu1 %v1001_v22 }
 0x14d   :  { %2460 = vmatprep.subr.mxu1 %v1016_v48 }
 0x14e   :  { %2461 = vmatpush3.msra.mxu1 %v1000_v51 }
 0x14f   :  { %2462 = vmatprep.subr.mxu1 %v1015_v21 }
 0x150   :  { %2463 = vmatpush3.msra.mxu1 %v999_v52 }
 0x151   :  { %2464 = vmatprep.subr.mxu1 %v1014_v6 }
 0x152   :  { %2465 = vmatpush3.msra.mxu1 %v998_v53 }
 0x153   :  { %2466 = vmatprep.subr.mxu1 %v1013_v49 }
 0x154   :  { %2467 = vmatpush3.msra.mxu1 %v997_v16 }
 0x155   :  { %2468 = vmatprep.subr.mxu1 %v1012_v7 }
 0x156   :  { %2469 = vmatpush3.msra.mxu1 %v996_v56 }
 0x157   :  { %2470 = vmatprep.subr.mxu1 %v1011_v57 }
 0x158   :  { %2471 = vmatpush3.msra.mxu1 %v995_v58 }
 0x159   :  { %2472 = vmatprep.subr.mxu1 %v1010_v18 }
 0x15a   :  { %2473 = vmatpush3.msra.mxu1 %v994_v46 }
 0x15b   :  { %2474 = vmatprep.subr.mxu1 %v1009_v59 }
 0x15c   :  { %2475 = vmatpush3.msra.mxu1 %v993_v60 }
 0x15d   :  { %2476 = vmatprep.subr.mxu1 %v1008_v13 }
 0x15e   :  { %2477 = vmatpush3.msra.mxu1 %v992_v61 }
 0x15f   :  { %2478 = vmatprep.subr.mxu1 %v1007_v27 }
 0x160   :  { %2479 = vmatpush3.msra.mxu1 %v991_v62 }
 0x161   :  { %2480 = vmatprep.subr.mxu1 %v1006_v37 }
 0x162   :  { %2481 = vmatpush3.msra.mxu1 %v990_v30 }
 0x163   :  { %2267 = vmatmul.mubr.msk.f32.vlgmr.msra.gmra.mxu1 %vm3777_vm8, %v2774_v8  ;;  %2700 = vmatprep.subr.mxu1 %v3238_v54 }
 0x164   :  { %2268 = vmatprep.mubr.msk.f32.mxu1 %vm3778_vm9, %v2774_v8  ;;  %2704 = vmatpush3.msra.mxu1 %v3238_v54 }
 0x165   :  { %2701 = vmatprep.subr.mxu1 %v3243_v55 }
 0x166   :  { %2705 = vmatpush3.msra.mxu1 %v3243_v55 }
 0x167   :  { %2269 = vmatmul.mubr.msk.f32.gmra.mxu1 %vm3779_vm10, %v2774_v8  ;;  %2702 = vmatprep.subr.mxu1 %v1614_v1 }
 0x168   :  { %2270 = vmatprep.mubr.msk.f32.mxu1 %vm3780_vm11, %v2774_v8  ;;  %2706 = vmatpush3.msra.mxu1 %v1614_v1 }
 0x16b   :  { %2271 = vmatmul.mubr.msk.f32.gmra.mxu1 %vm3781_vm12, %v2774_v8 }
 0x16c   :  { %2272 = vmatprep.mubr.msk.f32.mxu1 %vm3782_vm13, %v2774_v8 }
 0x16f   :  { %2273 = vmatmul.mubr.msk.f32.gmra.mxu1 %vm3783_vm3, %v2774_v8 }
 0x170   :  { %2274 = vmatprep.mubr.msk.f32.mxu1 %vm3784_vm4, %v2774_v8 }
 0x173   :  { %2275 = vmatmul.mubr.msk.f32.gmra.mxu1 %vm3785_vm5, %v2774_v8 }
 0x174   :  { %2276 = vmatprep.mubr.msk.f32.mxu1 %vm3786_vm6, %v2774_v8 }
 0x177   :  { %2277 = vmatmul.mubr.msk.f32.gmra.mxu1 %vm1253_vm15, %v2774_v8  ;;  %vm30_vm15 = vcmask 261120  }
 0x178   :  { %2278 = vmatprep.mubr.msk.f32.mxu1 %vm1258_vm14, %v2774_v8  ;;  %31 = vst.msk [vmem:[#allocation2] sm:$0xff] %vm30_vm15, %v2775_v2  ;;  %32 = vst.msk [vmem:[#allocation2 + $0x8] sm:$0xff] %vm30_vm15, %v2775_v2  ;;  %vm2140_vm14 = vcmask 130048  }
 0x179   :  { %33 = vst.msk [vmem:[#allocation2 + $0x10] sm:$0xff] %vm30_vm15, %v2775_v2  ;;  %34 = vst.msk [vmem:[#allocation2 + $0x18] sm:$0xff] %vm30_vm15, %v2775_v2 }
 0x17a   :  { %35 = vst.msk [vmem:[#allocation2 + $0x20] sm:$0xff] %vm30_vm15, %v2775_v2  ;;  %36 = vst.msk [vmem:[#allocation2 + $0x28] sm:$0xff] %vm30_vm15, %v2775_v2 }
 0x17b   :  { %2279 = vmatmul.mubr.msk.f32.gmra.mxu1 %vm1257_vm0, %v2774_v8  ;;  %37 = vst.msk [vmem:[#allocation2 + $0x30] sm:$0xff] %vm30_vm15, %v2775_v2  ;;  %38 = vst.msk [vmem:[#allocation2 + $0x38] sm:$0xff] %vm30_vm15, %v2775_v2 }
 0x17c   :  { %2280 = vmatprep.mubr.msk.f32.mxu1 %vm1262_vm2, %v2774_v8 }
 0x17f   :  { %2281 = vmatmul.mubr.msk.f32.gmra.mxu1 %vm1261_vm1, %v2774_v8  ;;  %v1613_v8 = vld [vmem:[%s3768_s4] sm:$0xff]  ;;  %v1368_v19 = vld [vmem:[#allocation2 + $0x8] sm:$0xff] }
 0x180   :  { %2646 = vmatprep.subr.mxu0 %v1613_v8  ;;  %2703 = vmatprep.subr.mxu1 %v1613_v8  ;;  %v1367_v39 = vld [vmem:[#allocation2] sm:$0xff]  ;;  %v1369_v16 = vld [vmem:[#allocation2 + $0x10] sm:$0xff]  ;;  %v1370_v57 = vld [vmem:[#allocation2 + $0x18] sm:$0xff] }
 0x181   :  { %2647 = vmatpush3.msra.mxu0 %v1613_v8  ;;  %2707 = vmatpush3.msra.mxu1 %v1613_v8  ;;  %v1371_v59 = vld [vmem:[#allocation2 + $0x20] sm:$0xff]  ;;  %v1372_v27 = vld [vmem:[#allocation2 + $0x28] sm:$0xff] }
 0x1e3   :  { %v2426_v9 = vpop.f32.mrf.mxu1 }
 0x1e5   :  { %v2427_v11 = vpop.f32.mrf.mxu1 }
 0x1e6   :  { %v2428_v22 = vadd.f32 %v2427_v11, %v2426_v9  ;;  %v1373_v11 = vld [vmem:[#allocation2 + $0x30] sm:$0xff] }
 0x1e7   :  { %v2429_v14 = vpop.f32.mrf.mxu1 }
 0x1e9   :  { %v2430_v17 = vpop.f32.mrf.mxu1 }
 0x1ea   :  { %v2431_v40 = vadd.f32 %v2430_v17, %v2429_v14 }
 0x1eb   :  { %v2432_v20 = vpop.f32.mrf.mxu1 }
 0x1ed   :  { %v2433_v23 = vpop.f32.mrf.mxu1 }
 0x1ee   :  { %v2434_v29 = vadd.f32 %v2433_v23, %v2432_v20 }
 0x1ef   :  { %v2435_v26 = vpop.f32.mrf.mxu1 }
 0x1f1   :  { %v2436_v32 = vpop.f32.mrf.mxu1 }
 0x1f2   :  { %v2437_v56 = vadd.f32 %v2436_v32, %v2435_v26 }
 0x1f3   :  { %v2438_v34 = vpop.f32.mrf.mxu1 }
 0x1f5   :  { %v2439_v54 = vpop.f32.mrf.mxu1 }
 0x1f6   :  { %v2440_v46 = vadd.f32 %v2439_v54, %v2438_v34  ;;  %v1374_v54 = vld [vmem:[#allocation2 + $0x38] sm:$0xff] }
 0x1f7   :  { %v2441_v55 = vpop.f32.mrf.mxu1 }
 0x1f9   :  { %v2442_v31 = vpop.f32.mrf.mxu1 }
 0x1fa   :  { %v2443_v61 = vadd.f32 %v2442_v31, %v2441_v55 }
 0x1fb   :  { %v2444_v36 = vpop.f32.mrf.mxu1 }
 0x1fd   :  { %v2445_v10 = vpop.f32.mrf.mxu1 }
 0x1fe   :  { %v2446_v2 = vadd.f32 %v2445_v10, %v2444_v36 }
 0x1ff   :  { %v3664_v15 = vpop.f32.mrf.mxu1 }
 0x201   :  { %v3666_v63 = vpop.f32.mrf.mxu1 }
 0x202   :  { %v2449_v26 = vadd.f32 %v3666_v63, %v3664_v15  ;;  %v2302_v15 = vld [vmem:[%s3768_s4 + $0x38] sm:$0xff]  ;;  %v2301_v63 = vld [vmem:[%s3768_s4 + $0x30] sm:$0xff] }
 0x203   :  { %2660 = vmatprep.subr.mxu1 %v2302_v15 }
 0x223   :  { %v2482_v38 = vpop.f32.mrf.mxu1 }
 0x225   :  { %v2483_v0 = vpop.f32.mrf.mxu1 }
 0x226   :  { %v2484_v50 = vadd.f32 %v2483_v0, %v2482_v38 }
 0x227   :  { %v2485_v48 = vpop.f32.mrf.mxu1 }
 0x228   :  { %v1547_v51 = vadd.f32 %v2484_v50, %v2428_v22  ;;  %v2300_v22 = vld [vmem:[%s3768_s4 + $0x28] sm:$0xff]  ;;  %v2299_v50 = vld [vmem:[%s3768_s4 + $0x20] sm:$0xff] }
 0x229   :  { %v2486_v35 = vpop.f32.mrf.mxu1 }
 0x22a   :  { %v1585_v21 = vadd.f32 %v1547_v51, %v1367_v39  ;;  %v2487_v52 = vadd.f32 %v2486_v35, %v2485_v48  ;;  %v2282_v39 = vld [vmem:[%s3769_s5] ss:$0 sm:$0xff] }
 0x22b   :  { %v2488_v41 = vpop.f32.mrf.mxu1 }
 0x22c   :  { %1594 = vst.msk [vmem:[#allocation2] sm:$0xff] %vm30_vm15, %v1585_v21  ;;  %v1552_v6 = vadd.f32 %v2487_v52, %v2431_v40 }
 0x22d   :  { %v2489_v53 = vpop.f32.mrf.mxu1 }
 0x22e   :  { %v1586_v42 = vadd.f32 %v1552_v6, %v1368_v19  ;;  %v2490_v49 = vadd.f32 %v2489_v53, %v2488_v41 }
 0x22f   :  { %v2491_v33 = vpop.f32.mrf.mxu1 }
 0x230   :  { %1595 = vst.msk [vmem:[#allocation2 + $0x8] sm:$0xff] %vm30_vm15, %v1586_v42  ;;  %v1557_v43 = vadd.f32 %v2490_v49, %v2434_v29 }
 0x231   :  { %v2492_v7 = vpop.f32.mrf.mxu1 }
 0x232   :  { %v1587_v5 = vadd.f32 %v1557_v43, %v1369_v16  ;;  %v2493_v44 = vadd.f32 %v2492_v7, %v2491_v33 }
 0x233   :  { %v2494_v58 = vpop.f32.mrf.mxu1  ;;  %v1605_v24 = vld [vmem:[#allocation2] sm:$0xff] }
 0x234   :  { %1596 = vst.msk [vmem:[#allocation2 + $0x10] sm:$0xff] %vm30_vm15, %v1587_v5  ;;  %v1562_v45 = vadd.f32 %v2493_v44, %v2437_v56  ;;  %2648 = vmatprep.mubr.msk.f32.mxu0 %vm30_vm15, %v1605_v24 }
 0x235   :  { %v2495_v18 = vpop.f32.mrf.mxu1 }
 0x236   :  { %v1588_v3 = vadd.f32 %v1562_v45, %v1370_v57  ;;  %v2496_v25 = vadd.f32 %v2495_v18, %v2494_v58 }
 0x237   :  { %v2497_v60 = vpop.f32.mrf.mxu1  ;;  %v1606_v4 = vld [vmem:[#allocation2 + $0x8] sm:$0xff] }
 0x238   :  { %1597 = vst.msk [vmem:[#allocation2 + $0x18] sm:$0xff] %vm30_vm15, %v1588_v3  ;;  %v1567_v47 = vadd.f32 %v2496_v25, %v2440_v46  ;;  %2649 = vmatmul.mubr.msk.f32.vlgmr.msra.gmra.mxu0 %vm30_vm15, %v1606_v4 }
 0x239   :  { %v2498_v13 = vpop.f32.mrf.mxu1 }
 0x23a   :  { %v1589_v12 = vadd.f32 %v1567_v47, %v1371_v59  ;;  %v2499_v28 = vadd.f32 %v2498_v13, %v2497_v60 }
 0x23b   :  { %v2500_v62 = vpop.f32.mrf.mxu1  ;;  %v1607_v37 = vld [vmem:[#allocation2 + $0x10] sm:$0xff] }
 0x23c   :  { %1598 = vst.msk [vmem:[#allocation2 + $0x20] sm:$0xff] %vm30_vm15, %v1589_v12  ;;  %v1572_v30 = vadd.f32 %v2499_v28, %v2443_v61  ;;  %2651 = vmatprep.mubr.msk.f32.mxu0 %vm30_vm15, %v1607_v37 }
 0x23d   :  { %v2501_v1 = vpop.f32.mrf.mxu1 }
 0x23e   :  { %v1590_v8 = vadd.f32 %v1572_v30, %v1372_v27  ;;  %v2502_v9 = vadd.f32 %v2501_v1, %v2500_v62 }
 0x23f   :  { %v2503_v14 = vpop.f32.mrf.mxu1  ;;  %v1608_v17 = vld [vmem:[#allocation2 + $0x18] sm:$0xff] }
 0x240   :  { %1599 = vst.msk [vmem:[#allocation2 + $0x28] sm:$0xff] %vm30_vm15, %v1590_v8  ;;  %v1577_v20 = vadd.f32 %v2502_v9, %v2446_v2  ;;  %2652 = vmatmul.mubr.msk.f32.gmra.mxu0 %vm30_vm15, %v1608_v17 }
 0x241   :  { %v2504_v23 = vpop.f32.mrf.mxu1 }
 0x242   :  { %v1591_v32 = vadd.f32 %v1577_v20, %v1373_v11  ;;  %v2505_v34 = vadd.f32 %v2504_v23, %v2503_v14 }
 0x243   :  { %v1609_v55 = vld [vmem:[#allocation2 + $0x20] sm:$0xff] }
 0x244   :  { %1600 = vst.msk [vmem:[#allocation2 + $0x30] sm:$0xff] %vm30_vm15, %v1591_v32  ;;  %v1582_v31 = vadd.f32 %v2505_v34, %v2449_v26  ;;  %2654 = vmatprep.mubr.msk.f32.mxu1 %vm30_vm15, %v1609_v55 }
 0x246   :  { %v1592_v36 = vadd.f32 %v1582_v31, %v1374_v54 }
 0x247   :  { %v1610_v10 = vld [vmem:[#allocation2 + $0x28] sm:$0xff] }
 0x248   :  { %1601 = vst.msk [vmem:[#allocation2 + $0x38] sm:$0xff] %vm30_vm15, %v1592_v36  ;;  %2655 = vmatmul.mubr.msk.f32.vlgmr.msra.gmra.mxu1 %vm30_vm15, %v1610_v10  ;;  %v2010_v10 = vld [vmem:[%s3770_s6 + $0x18] sm:$0xff] }
 0x249   :  { %2661 = vmatpush3.msra.mxu1 %v2302_v15  ;;  %v2007_v15 = vld [vmem:[%s3770_s6] sm:$0xff] }
 0x24a   :  { %2662 = vmatprep.subr.mxu1 %v2301_v63 }
 0x24b   :  { %v1611_v38 = vld [vmem:[#allocation2 + $0x30] sm:$0xff]  ;;  %2663 = vmatpush3.msra.mxu1 %v2301_v63  ;;  %v2304_v63 = vld [vmem:[%s3769_s5 + $0x1] ss:$0 sm:$0xff] }
 0x24c   :  { %2657 = vmatprep.mubr.msk.f32.mxu1 %vm30_vm15, %v1611_v38  ;;  %2664 = vmatprep.subr.mxu1 %v2300_v22  ;;  %v2009_v38 = vld [vmem:[%s3770_s6 + $0x10] sm:$0xff] }
 0x24d   :  { %2665 = vmatpush3.msra.mxu1 %v2300_v22 }
 0x24e   :  { %2666 = vmatprep.subr.mxu1 %v2299_v50 }
 0x24f   :  { %v1612_v0 = vld [vmem:[#allocation2 + $0x38] sm:$0xff]  ;;  %2667 = vmatpush3.msra.mxu1 %v2299_v50 }
 0x250   :  { %2658 = vmatmul.mubr.msk.f32.gmra.mxu1 %vm30_vm15, %v1612_v0  ;;  %2680 = vmatprep.subr.mxu1 %v2010_v10  ;;  %v2008_v0 = vld [vmem:[%s3770_s6 + $0x8] sm:$0xff] }
 0x2f8   :  { %v2650_v48 = vpop.f32.mrf.mxu0 }
 0x2f9   :  { %v1720_v51 = vadd.f32 %v2650_v48, %v2282_v39 }
 0x2fa   :  { %v1714_v35 = vpop.f32.mrf.mxu0 }
 0x2fb   :  { %v2292_v40 = vmul.f32 -1.442695, %v1720_v51  ;;  %v1715_v21 = vadd.f32 %v2282_v39, %v1714_v35 }
 0x2fd   :  { %2710 = vpow2.f32 %v2292_v40  ;;  %v2291_v52 = vmul.f32 -1.442695, %v1715_v21 }
 0x2ff   :  { %2712 = vpow2.f32 %v2291_v52 }
 0x300   :  { %v2653_v19 = vpop.f32.mrf.mxu0 }
 0x301   :  { %v1730_v41 = vadd.f32 %v2653_v19, %v2282_v39 }
 0x302   :  { %v1724_v6 = vpop.f32.mrf.mxu0 }
 0x303   :  { %v2294_v53 = vmul.f32 -1.442695, %v1730_v41  ;;  %v1725_v29 = vadd.f32 %v2282_v39, %v1724_v6 }
 0x305   :  { %2714 = vpow2.f32 %v2294_v53  ;;  %v2293_v42 = vmul.f32 -1.442695, %v1725_v29 }
 0x307   :  { %2716 = vpow2.f32 %v2293_v42 }
 0x308   :  { %v2656_v49 = vpop.f32.mrf.mxu1 }
 0x309   :  { %v1740_v16 = vadd.f32 %v2656_v49, %v2282_v39 }
 0x30a   :  { %v2711_v33 = vpop.eup %2710  ;;  %v1734_v43 = vpop.f32.mrf.mxu1 }
 0x30b   :  { %v1778_v7 = vadd.f32 1.0, %v2711_v33  ;;  %v2296_v56 = vmul.f32 -1.442695, %v1740_v16  ;;  %v1735_v5 = vadd.f32 %v2282_v39, %v1734_v43 }
 0x30c   :  { %v2713_v44 = vpop.eup %2712 }
 0x30d   :  { %2718 = vrcp.f32 %v1778_v7  ;;  %v1777_v57 = vadd.f32 1.0, %v2713_v44  ;;  %v2295_v58 = vmul.f32 -1.442695, %v1735_v5 }
 0x30e   :  { %2720 = vpow2.f32 %v2296_v56 }
 0x30f   :  { %2722 = vrcp.f32 %v1777_v57 }
 0x310   :  { %2724 = vpow2.f32 %v2295_v58  ;;  %v2659_v24 = vpop.f32.mrf.mxu1 }
 0x311   :  { %v1750_v45 = vadd.f32 %v2659_v24, %v2282_v39 }
 0x312   :  { %v2715_v18 = vpop.eup %2714  ;;  %v1744_v46 = vpop.f32.mrf.mxu1 }
 0x313   :  { %v1780_v3 = vadd.f32 1.0, %v2715_v18  ;;  %v2298_v25 = vmul.f32 -1.442695, %v1750_v45  ;;  %v1745_v59 = vadd.f32 %v2282_v39, %v1744_v46 }
 0x314   :  { %v2717_v60 = vpop.eup %2716 }
 0x315   :  { %2726 = vrcp.f32 %v1780_v3  ;;  %v1779_v4 = vadd.f32 1.0, %v2717_v60  ;;  %v2297_v47 = vmul.f32 -1.442695, %v1745_v59 }
 0x316   :  { %2728 = vpow2.f32 %v2298_v25 }
 0x317   :  { %2730 = vrcp.f32 %v1779_v4 }
 0x318   :  { %2732 = vpow2.f32 %v2297_v47 }
 0x31a   :  { %v2719_v13 = vpop.eup %2718 }
 0x31b   :  { %v2721_v61 = vpop.eup %2720  ;;  %v1802_v37 = vmul.f32 %v2719_v13, %v1720_v51 }
 0x31c   :  { %v2723_v12 = vpop.eup %2722  ;;  %v1782_v28 = vadd.f32 1.0, %v2721_v61 }
 0x31d   :  { %v2725_v27 = vpop.eup %2724  ;;  %v1801_v62 = vmul.f32 %v2723_v12, %v1715_v21 }
 0x31e   :  { %v1781_v30 = vadd.f32 1.0, %v2725_v27  ;;  %2734 = vrcp.f32 %v1782_v28 }
 0x31f   :  { %2668 = vmatprep.mubr.msk.f32.mxu1 %vm30_vm15, %v1801_v62 }
 0x320   :  { %2736 = vrcp.f32 %v1781_v30  ;;  %2669 = vmatmul.mubr.msk.f32.vlgmr.msra.gmra.mxu1 %vm30_vm15, %v1802_v37 }
 0x321   :  { %2681 = vmatpush3.msra.mxu1 %v2010_v10 }
 0x322   :  { %v2727_v1 = vpop.eup %2726  ;;  %2682 = vmatprep.subr.mxu1 %v2009_v38 }
 0x323   :  { %v2729_v2 = vpop.eup %2728  ;;  %v1804_v17 = vmul.f32 %v2727_v1, %v1730_v41  ;;  %2683 = vmatpush3.msra.mxu1 %v2009_v38 }
 0x324   :  { %v2731_v8 = vpop.eup %2730  ;;  %v1784_v9 = vadd.f32 1.0, %v2729_v2  ;;  %2684 = vmatprep.subr.mxu1 %v2008_v0 }
 0x325   :  { %v2733_v11 = vpop.eup %2732  ;;  %v1803_v14 = vmul.f32 %v2731_v8, %v1725_v29  ;;  %2685 = vmatpush3.msra.mxu1 %v2008_v0 }
 0x326   :  { %v1783_v20 = vadd.f32 1.0, %v2733_v11  ;;  %2738 = vrcp.f32 %v1784_v9  ;;  %2686 = vmatprep.subr.mxu1 %v2007_v15 }
 0x327   :  { %2671 = vmatprep.mubr.msk.f32.mxu1 %vm30_vm15, %v1803_v14  ;;  %2687 = vmatpush3.msra.mxu1 %v2007_v15 }
 0x328   :  { %2740 = vrcp.f32 %v1783_v20  ;;  %2672 = vmatmul.mubr.msk.f32.gmra.mxu1 %vm30_vm15, %v1804_v17 }
 0x32b   :  { %v2735_v23 = vpop.eup %2734 }
 0x32c   :  { %v1806_v34 = vmul.f32 %v2735_v23, %v1740_v16 }
 0x32d   :  { %v2737_v26 = vpop.eup %2736 }
 0x32e   :  { %v1805_v32 = vmul.f32 %v2737_v26, %v1735_v5 }
 0x330   :  { %2674 = vmatprep.mubr.msk.f32.mxu1 %vm30_vm15, %v1805_v32 }
 0x331   :  { %2675 = vmatmul.mubr.msk.f32.gmra.mxu1 %vm30_vm15, %v1806_v34 }
 0x333   :  { %v2739_v54 = vpop.eup %2738 }
 0x334   :  { %v1808_v36 = vmul.f32 %v2739_v54, %v1750_v45 }
 0x335   :  { %v2741_v55 = vpop.eup %2740 }
 0x336   :  { %v1807_v31 = vmul.f32 %v2741_v55, %v1745_v59 }
 0x338   :  { %2677 = vmatprep.mubr.msk.f32.mxu1 %vm30_vm15, %v1807_v31 }
 0x339   :  { %2678 = vmatmul.mubr.msk.f32.gmra.mxu1 %vm30_vm15, %v1808_v36 }
 0x3e0   :  { %v2670_v22 = vpop.f32.mrf.mxu1 }
 0x3e1   :  { %v1918_v50 = vadd.f32 %v2670_v22, %v2304_v63 }
 0x3e2   :  { %v1912_v39 = vpop.f32.mrf.mxu1 }
 0x3e3   :  { %v2314_v48 = vmul.f32 -1.442695, %v1918_v50  ;;  %v1913_v51 = vadd.f32 %v2304_v63, %v1912_v39 }
 0x3e5   :  { %2742 = vpow2.f32 %v2314_v48  ;;  %v2313_v35 = vmul.f32 -1.442695, %v1913_v51 }
 0x3e7   :  { %2744 = vpow2.f32 %v2313_v35 }
 0x3e8   :  { %v2673_v40 = vpop.f32.mrf.mxu1 }
 0x3e9   :  { %v1928_v21 = vadd.f32 %v2673_v40, %v2304_v63 }
 0x3ea   :  { %v1922_v52 = vpop.f32.mrf.mxu1 }
 0x3eb   :  { %v2316_v19 = vmul.f32 -1.442695, %v1928_v21  ;;  %v1923_v41 = vadd.f32 %v2304_v63, %v1922_v52 }
 0x3ed   :  { %2746 = vpow2.f32 %v2316_v19  ;;  %v2315_v6 = vmul.f32 -1.442695, %v1923_v41 }
 0x3ef   :  { %2748 = vpow2.f32 %v2315_v6 }
 0x3f1   :  { %v2676_v53 = vpop.f32.mrf.mxu1 }
 0x3f2   :  { %v2743_v29 = vpop.eup %2742  ;;  %v1938_v42 = vadd.f32 %v2676_v53, %v2304_v63 }
 0x3f3   :  { %v1976_v49 = vadd.f32 1.0, %v2743_v29  ;;  %v1932_v16 = vpop.f32.mrf.mxu1 }
 0x3f4   :  { %v2745_v33 = vpop.eup %2744  ;;  %v2318_v43 = vmul.f32 -1.442695, %v1938_v42  ;;  %v1933_v7 = vadd.f32 %v2304_v63, %v1932_v16 }
 0x3f5   :  { %2750 = vrcp.f32 %v1976_v49  ;;  %v1975_v56 = vadd.f32 1.0, %v2745_v33 }
 0x3f6   :  { %2752 = vpow2.f32 %v2318_v43  ;;  %v2317_v5 = vmul.f32 -1.442695, %v1933_v7 }
 0x3f7   :  { %2754 = vrcp.f32 %v1975_v56 }
 0x3f8   :  { %2756 = vpow2.f32 %v2317_v5 }
 0x3f9   :  { %v2679_v44 = vpop.f32.mrf.mxu1 }
 0x3fa   :  { %v2747_v57 = vpop.eup %2746  ;;  %v1948_v58 = vadd.f32 %v2679_v44, %v2304_v63 }
 0x3fb   :  { %v1978_v24 = vadd.f32 1.0, %v2747_v57  ;;  %v1942_v45 = vpop.f32.mrf.mxu1 }
 0x3fc   :  { %v2749_v18 = vpop.eup %2748  ;;  %v2320_v46 = vmul.f32 -1.442695, %v1948_v58  ;;  %v1943_v3 = vadd.f32 %v2304_v63, %v1942_v45 }
 0x3fd   :  { %2758 = vrcp.f32 %v1978_v24  ;;  %v1977_v25 = vadd.f32 1.0, %v2749_v18 }
 0x3fe   :  { %2760 = vpow2.f32 %v2320_v46  ;;  %v2319_v59 = vmul.f32 -1.442695, %v1943_v3 }
 0x3ff   :  { %2762 = vrcp.f32 %v1977_v25 }
 0x400   :  { %2764 = vpow2.f32 %v2319_v59 }
 0x402   :  { %v2751_v60 = vpop.eup %2750 }
 0x403   :  { %v2753_v4 = vpop.eup %2752  ;;  %v2000_v28 = vmul.f32 %v2751_v60, %v1918_v50 }
 0x404   :  { %v2755_v47 = vpop.eup %2754  ;;  %v1980_v13 = vadd.f32 1.0, %v2753_v4 }
 0x405   :  { %v2757_v61 = vpop.eup %2756  ;;  %v1999_v12 = vmul.f32 %v2755_v47, %v1913_v51 }
 0x406   :  { %v1979_v27 = vadd.f32 1.0, %v2757_v61  ;;  %2766 = vrcp.f32 %v1980_v13 }
 0x407   :  { %2688 = vmatprep.mubr.msk.f32.mxu1 %vm30_vm15, %v1999_v12 }
 0x408   :  { %2768 = vrcp.f32 %v1979_v27  ;;  %2689 = vmatmul.mubr.msk.f32.vlgmr.msra.gmra.mxu1 %vm30_vm15, %v2000_v28 }
 0x40a   :  { %v2759_v62 = vpop.eup %2758 }
 0x40b   :  { %v2761_v37 = vpop.eup %2760  ;;  %v2002_v9 = vmul.f32 %v2759_v62, %v1928_v21 }
 0x40c   :  { %v2763_v30 = vpop.eup %2762  ;;  %v1982_v1 = vadd.f32 1.0, %v2761_v37 }
 0x40d   :  { %v2765_v2 = vpop.eup %2764  ;;  %v2001_v8 = vmul.f32 %v2763_v30, %v1923_v41 }
 0x40e   :  { %v1981_v11 = vadd.f32 1.0, %v2765_v2  ;;  %2770 = vrcp.f32 %v1982_v1 }
 0x40f   :  { %2691 = vmatprep.mubr.msk.f32.mxu1 %vm30_vm15, %v2001_v8 }
 0x410   :  { %2772 = vrcp.f32 %v1981_v11  ;;  %2692 = vmatmul.mubr.msk.f32.gmra.mxu1 %vm30_vm15, %v2002_v9 }
 0x413   :  { %v2767_v14 = vpop.eup %2766 }
 0x414   :  { %v2004_v23 = vmul.f32 %v2767_v14, %v1938_v42 }
 0x415   :  { %v2769_v17 = vpop.eup %2768 }
 0x416   :  { %v2003_v20 = vmul.f32 %v2769_v17, %v1933_v7 }
 0x418   :  { %2694 = vmatprep.mubr.msk.f32.mxu1 %vm30_vm15, %v2003_v20 }
 0x419   :  { %2695 = vmatmul.mubr.msk.f32.gmra.mxu1 %vm30_vm15, %v2004_v23 }
 0x41b   :  { %v2771_v26 = vpop.eup %2770 }
 0x41c   :  { %v2006_v54 = vmul.f32 %v2771_v26, %v1948_v58 }
 0x41d   :  { %v2773_v32 = vpop.eup %2772 }
 0x41e   :  { %v2005_v34 = vmul.f32 %v2773_v32, %v1943_v3 }
 0x420   :  { %2697 = vmatprep.mubr.msk.f32.mxu1 %vm30_vm15, %v2005_v34 }
 0x421   :  { %2698 = vmatmul.mubr.msk.f32.gmra.mxu1 %vm30_vm15, %v2006_v54 }
 0x4c8   :  { %v2690_v55 = vpop.f32.mrf.mxu1 }
 0x4c9   :  { %2142 = vst.msk [vmem:[%s3771_s7 + $0x8] sm:$0xff] %vm2140_vm14, %v2690_v55 }
 0x4ca   :  { %v2101_v31 = vpop.f32.mrf.mxu1 }
 0x4cb   :  { %2141 = vst.msk [vmem:[%s3771_s7] sm:$0xff] %vm2140_vm14, %v2101_v31 }
 0x4d0   :  { %v2693_v36 = vpop.f32.mrf.mxu1 }
 0x4d1   :  { %2144 = vst.msk [vmem:[%s3771_s7 + $0x18] sm:$0xff] %vm2140_vm14, %v2693_v36 }
 0x4d2   :  { %v2111_v10 = vpop.f32.mrf.mxu1 }
 0x4d3   :  { %2143 = vst.msk [vmem:[%s3771_s7 + $0x10] sm:$0xff] %vm2140_vm14, %v2111_v10 }
 0x4d9   :  { %v2696_v38 = vpop.f32.mrf.mxu1 }
 0x4da   :  { %2146 = vst.msk [vmem:[%s3771_s7 + $0x28] sm:$0xff] %vm2140_vm14, %v2696_v38 }
 0x4db   :  { %v2121_v0 = vpop.f32.mrf.mxu1 }
 0x4dc   :  { %2145 = vst.msk [vmem:[%s3771_s7 + $0x20] sm:$0xff] %vm2140_vm14, %v2121_v0 }
 0x4e1   :  { %v2699_v15 = vpop.f32.mrf.mxu1 }
 0x4e2   :  { %2148 = vst.msk [vmem:[%s3771_s7 + $0x38] sm:$0xff] %vm2140_vm14, %v2699_v15 }
 0x4e3   :  { %v2131_v63 = vpop.f32.mrf.mxu1 }
 0x4e4   :  { %2147 = vst.msk [vmem:[%s3771_s7 + $0x30] sm:$0xff] %vm2140_vm14, %v2131_v63 }

</bundles_post_ra>
